<compile_context>
chip_gen: v6e
topology: v6e:2x2x1
jax: 0.10.0
libtpu: 0.0.40
codegen_flags: <defaults>
</compile_context>

<pallas_src>
import jax
import jax.numpy as jnp
from jax.experimental import pallas as pl
from jax.experimental.pallas import tpu as pltpu

LAYER_NUMS = [5, 6, 7]  # as in FeaturePyramidNet.__init__


def _round_up(x, m):
    return ((x + m - 1) // m) * m


def _conv_mm_kernel(x_ref, w_ref, b_ref, o_ref):
    """One M-tile: out = relu(x @ w + b), taps folded into the K dimension."""
    acc = jnp.dot(x_ref[...], w_ref[...], preferred_element_type=jnp.float32)
    o_ref[...] = jnp.maximum(acc + b_ref[...], 0.0).astype(o_ref.dtype)


def conv3x3_relu_pallas(x_nhwc, w, b, stride):
    """3x3 conv (padding=1, given stride) + bias + ReLU.

    x_nhwc: (N, H, W, Cin) float32
    w     : (3, 3, Cin, Cout) float32
    b     : (Cout,) float32
    """
    N, H, W, Cin = x_nhwc.shape
    Cout = w.shape[-1]
    Ho = (H + 2 - 3) // stride + 1
    Wo = (W + 2 - 3) // stride + 1
    M = N * Ho * Wo
    K = 9 * Cin
    Coutp = _round_up(Cout, 128)  # lane-dense output stores

    # Glue (pure data movement, fuses under jit): pad + 9 shifted/strided tap
    # views concatenated along channels -> (M, 9*Cin) in bf16.
    x_pad = jnp.pad(x_nhwc, ((0, 0), (1, 1), (1, 1), (0, 0))).astype(jnp.bfloat16)
    taps = [
        x_pad[:, kh:kh + Ho * stride:stride, kw:kw + Wo * stride:stride, :]
        for kh in range(3) for kw in range(3)
    ]
    x_slab = jnp.concatenate(taps, axis=-1).reshape(M, K)

    # Tile M against a conservative VMEM budget (double-buffered x + out tiles
    # plus resident weights/bias), sized to fit v7x (64 MiB phys / 32 scoped).
    budget = 16 * 1024 * 1024
    fixed = 2 * (K * Coutp * 2 + Coutp * 4)        # weights (bf16) + bias, x2 bufs
    per_row = 2 * (K * 2) + 2 * (Coutp * 4)        # x tile (bf16) + out tile (f32)
    tm = max(16, (budget - fixed) // per_row)
    tm = min(tm, 1024, _round_up(M, 16))
    tm = max(16, (tm // 16) * 16)
    M_pad = _round_up(M, tm)
    if M_pad > M:
        x_slab = jnp.pad(x_slab, ((0, M_pad - M), (0, 0)))

    # Weights: (3,3,Cin,Cout) -> (9*Cin, Cout) in (kh, kw, cin) order, matching
    # the tap concatenation order; pad Cout to the lane-dense width.
    w_mat = w.reshape(K, Cout).astype(jnp.bfloat16)
    w_mat = jnp.pad(w_mat, ((0, 0), (0, Coutp - Cout)))
    b2 = jnp.pad(b.astype(jnp.float32), (0, Coutp - Cout)).reshape(1, Coutp)

    out_flat = pl.pallas_call(
        _conv_mm_kernel,
        out_shape=jax.ShapeDtypeStruct((M_pad, Coutp), jnp.float32),
        grid=(M_pad // tm,),
        in_specs=[
            pl.BlockSpec((tm, K), lambda m: (m, 0)),
            pl.BlockSpec((K, Coutp), lambda m: (0, 0)),
            pl.BlockSpec((1, Coutp), lambda m: (0, 0)),
        ],
        out_specs=pl.BlockSpec((tm, Coutp), lambda m: (m, 0)),
        compiler_params=pltpu.CompilerParams(
            dimension_semantics=("parallel",),
            vmem_limit_bytes=32 * 1024 * 1024,
        ),
    )(x_slab, w_mat, b2)

    # Slice away M padding and lane padding; fuses into downstream consumers.
    return out_flat[:M, :Cout].reshape(N, Ho, Wo, Cout)


def init_cut_model_params(key, in_ch, channels):
    """Deterministic synthetic parameters for the 8 children of `cut_model`."""
    params = []
    c_prev = in_ch
    for c in channels:
        key, k_w, k_b = jax.random.split(key, 3)
        # PyTorch Conv2d weight layout (Cout, Cin, 3, 3) -> (3, 3, Cin, Cout)
        w = jax.random.normal(k_w, (c, c_prev, 3, 3), jnp.float32)
        w = w * (1.0 / jnp.sqrt(9.0 * c_prev))
        b = jax.random.normal(k_b, (c,), jnp.float32) * 0.01
        params.append((jnp.transpose(w, (2, 3, 1, 0)), b))
        c_prev = c
    return params


def feature_pyramid_net_forward(x_nchw, params, strides):
    """FeaturePyramidNet.forward: run the encoder's children sequentially,
    record activations at LAYER_NUMS, return feats[LAYER_NUMS[-1]]."""
    # TODO(synk): late pyramid stages (tiny spatial dims) could be fused into a
    # single pallas_call keeping activations VMEM-resident; kept per-layer here.
    layer_set = set(LAYER_NUMS)
    x = jnp.transpose(x_nchw, (0, 2, 3, 1))  # NCHW -> NHWC
    activations = {}
    for ln, ((w, b), s) in enumerate(zip(params, strides)):
        x = conv3x3_relu_pallas(x, w, b, s)
        if ln in layer_set:
            activations[ln] = x
    low_res_feats = activations[LAYER_NUMS[-1]]
    return jnp.transpose(low_res_feats, (0, 3, 1, 2))  # NHWC -> NCHW


if __name__ == "__main__":
    # small shapes consistent with the module (input image, NCHW)
    key = jax.random.PRNGKey(0)
    k_x, k_p = jax.random.split(key)
    x = jax.random.normal(k_x, (2, 4, 16, 16), jnp.float32)

    # 8 children -> layer index 7 exists; a down-sampling pyramid like ResNet
    channels = [8, 8, 16, 16, 32, 32, 64, 64]
    strides = [1, 1, 2, 1, 2, 1, 2, 1]
    params = init_cut_model_params(k_p, x.shape[1], channels)

    fwd = jax.jit(lambda xx: feature_pyramid_net_forward(xx, params, strides))
    out = fwd(x)
    out = jax.block_until_ready(out)
    assert out.shape == (2, 64, 2, 2), out.shape
    print("KERNEL_OK")
</pallas_src>

<mosaic_0001>
module attributes {stable_mosaic.version = 11 : i64} {
  func.func @_conv_mm_kernel(%arg0: i32, %arg1: memref<512x36xbf16, #tpu.memory_space<vmem>>, %arg2: memref<36x128xbf16, #tpu.memory_space<vmem>>, %arg3: memref<1x128xf32, #tpu.memory_space<vmem>>, %arg4: memref<512x128xf32, #tpu.memory_space<vmem>>) attributes {dimension_semantics = [#tpu.dimension_semantics<parallel>], iteration_bounds = array<i64: 1>, scalar_prefetch = 0 : i64, scratch_operands = 0 : i64, tpu.core_type = #tpu.core_type<tc>, window_params = [{transform_indices = @transform_0, window_bounds = array<i64: 512, 36>}, {pipeline_mode = #tpu.pipeline_mode<synchronous>, transform_indices = @transform_1, window_bounds = array<i64: 36, 128>}, {pipeline_mode = #tpu.pipeline_mode<synchronous>, transform_indices = @transform_2, window_bounds = array<i64: 1, 128>}, {transform_indices = @transform_3, window_bounds = array<i64: 512, 128>}]} {
    %c0 = arith.constant 0 : index
    %c0_0 = arith.constant 0 : index
    %0 = vector.load %arg1[%c0, %c0_0] : memref<512x36xbf16, #tpu.memory_space<vmem>>, vector<512x36xbf16>
    %c0_1 = arith.constant 0 : index
    %c0_2 = arith.constant 0 : index
    %1 = vector.load %arg2[%c0_1, %c0_2] : memref<36x128xbf16, #tpu.memory_space<vmem>>, vector<36x128xbf16>
    %cst = arith.constant dense<0.000000e+00> : vector<512x128xf32>
    %2 = tpu.matmul %0, %1, %cst {dimension_numbers = #tpu.dot_dimension_numbers<[1], [0], [0], [1], [0, 0, 1, 1], [], []>} : vector<512x36xbf16>, vector<36x128xbf16>, vector<512x128xf32> -> vector<512x128xf32>
    %c0_3 = arith.constant 0 : index
    %c0_4 = arith.constant 0 : index
    %3 = vector.load %arg3[%c0_3, %c0_4] : memref<1x128xf32, #tpu.memory_space<vmem>>, vector<1x128xf32>
    %4 = vector.broadcast %3 : vector<1x128xf32> to vector<512x128xf32>
    %5 = arith.addf %2, %4 : vector<512x128xf32>
    %cst_5 = arith.constant 0.000000e+00 : f32
    %6 = vector.broadcast %cst_5 : f32 to vector<512x128xf32>
    %7 = arith.maximumf %5, %6 : vector<512x128xf32>
    %c0_6 = arith.constant 0 : index
    %c0_7 = arith.constant 0 : index
    %8 = vector.load %arg4[%c0_6, %c0_7] : memref<512x128xf32, #tpu.memory_space<vmem>>, vector<512x128xf32>
    tpu.vector_store %arg4[%c0_6, %c0_7], %7 {strides = array<i32>} : memref<512x128xf32, #tpu.memory_space<vmem>>, vector<512x128xf32>,
    return
  }
  func.func @transform_0(%arg0: i32) -> (i32, i32) {
    %c0_i32 = arith.constant 0 : i32
    %c0_i32_0 = arith.constant 0 : i32
    return %arg0, %c0_i32 : i32, i32
  }
  func.func @transform_1(%arg0: i32) -> (i32, i32) {
    %c0_i32 = arith.constant 0 : i32
    %c0_i32_0 = arith.constant 0 : i32
    %c0_i32_1 = arith.constant 0 : i32
    return %c0_i32, %c0_i32_0 : i32, i32
  }
  func.func @transform_2(%arg0: i32) -> (i32, i32) {
    %c0_i32 = arith.constant 0 : i32
    %c0_i32_0 = arith.constant 0 : i32
    %c0_i32_1 = arith.constant 0 : i32
    return %c0_i32, %c0_i32_0 : i32, i32
  }
  func.func @transform_3(%arg0: i32) -> (i32, i32) {
    %c0_i32 = arith.constant 0 : i32
    %c0_i32_0 = arith.constant 0 : i32
    return %arg0, %c0_i32 : i32, i32
  }
}

module attributes {stable_mosaic.version = 11 : i64} {
  func.func @_conv_mm_kernel(%arg0: i32, %arg1: memref<512x72xbf16, #tpu.memory_space<vmem>>, %arg2: memref<72x128xbf16, #tpu.memory_space<vmem>>, %arg3: memref<1x128xf32, #tpu.memory_space<vmem>>, %arg4: memref<512x128xf32, #tpu.memory_space<vmem>>) attributes {dimension_semantics = [#tpu.dimension_semantics<parallel>], iteration_bounds = array<i64: 1>, scalar_prefetch = 0 : i64, scratch_operands = 0 : i64, tpu.core_type = #tpu.core_type<tc>, window_params = [{transform_indices = @transform_0, window_bounds = array<i64: 512, 72>}, {pipeline_mode = #tpu.pipeline_mode<synchronous>, transform_indices = @transform_1, window_bounds = array<i64: 72, 128>}, {pipeline_mode = #tpu.pipeline_mode<synchronous>, transform_indices = @transform_2, window_bounds = array<i64: 1, 128>}, {transform_indices = @transform_3, window_bounds = array<i64: 512, 128>}]} {
    %c0 = arith.constant 0 : index
    %c0_0 = arith.constant 0 : index
    %0 = vector.load %arg1[%c0, %c0_0] : memref<512x72xbf16, #tpu.memory_space<vmem>>, vector<512x72xbf16>
    %c0_1 = arith.constant 0 : index
    %c0_2 = arith.constant 0 : index
    %1 = vector.load %arg2[%c0_1, %c0_2] : memref<72x128xbf16, #tpu.memory_space<vmem>>, vector<72x128xbf16>
    %cst = arith.constant dense<0.000000e+00> : vector<512x128xf32>
    %2 = tpu.matmul %0, %1, %cst {dimension_numbers = #tpu.dot_dimension_numbers<[1], [0], [0], [1], [0, 0, 1, 1], [], []>} : vector<512x72xbf16>, vector<72x128xbf16>, vector<512x128xf32> -> vector<512x128xf32>
    %c0_3 = arith.constant 0 : index
    %c0_4 = arith.constant 0 : index
    %3 = vector.load %arg3[%c0_3, %c0_4] : memref<1x128xf32, #tpu.memory_space<vmem>>, vector<1x128xf32>
    %4 = vector.broadcast %3 : vector<1x128xf32> to vector<512x128xf32>
    %5 = arith.addf %2, %4 : vector<512x128xf32>
    %cst_5 = arith.constant 0.000000e+00 : f32
    %6 = vector.broadcast %cst_5 : f32 to vector<512x128xf32>
    %7 = arith.maximumf %5, %6 : vector<512x128xf32>
    %c0_6 = arith.constant 0 : index
    %c0_7 = arith.constant 0 : index
    %8 = vector.load %arg4[%c0_6, %c0_7] : memref<512x128xf32, #tpu.memory_space<vmem>>, vector<512x128xf32>
    tpu.vector_store %arg4[%c0_6, %c0_7], %7 {strides = array<i32>} : memref<512x128xf32, #tpu.memory_space<vmem>>, vector<512x128xf32>,
    return
  }
  func.func @transform_0(%arg0: i32) -> (i32, i32) {
    %c0_i32 = arith.constant 0 : i32
    %c0_i32_0 = arith.constant 0 : i32
    return %arg0, %c0_i32 : i32, i32
  }
  func.func @transform_1(%arg0: i32) -> (i32, i32) {
    %c0_i32 = arith.constant 0 : i32
    %c0_i32_0 = arith.constant 0 : i32
    %c0_i32_1 = arith.constant 0 : i32
    return %c0_i32, %c0_i32_0 : i32, i32
  }
  func.func @transform_2(%arg0: i32) -> (i32, i32) {
    %c0_i32 = arith.constant 0 : i32
    %c0_i32_0 = arith.constant 0 : i32
    %c0_i32_1 = arith.constant 0 : i32
    return %c0_i32, %c0_i32_0 : i32, i32
  }
  func.func @transform_3(%arg0: i32) -> (i32, i32) {
    %c0_i32 = arith.constant 0 : i32
    %c0_i32_0 = arith.constant 0 : i32
    return %arg0, %c0_i32 : i32, i32
  }
}

module attributes {stable_mosaic.version = 11 : i64} {
  func.func @_conv_mm_kernel(%arg0: i32, %arg1: memref<128x72xbf16, #tpu.memory_space<vmem>>, %arg2: memref<72x128xbf16, #tpu.memory_space<vmem>>, %arg3: memref<1x128xf32, #tpu.memory_space<vmem>>, %arg4: memref<128x128xf32, #tpu.memory_space<vmem>>) attributes {dimension_semantics = [#tpu.dimension_semantics<parallel>], iteration_bounds = array<i64: 1>, scalar_prefetch = 0 : i64, scratch_operands = 0 : i64, tpu.core_type = #tpu.core_type<tc>, window_params = [{transform_indices = @transform_0, window_bounds = array<i64: 128, 72>}, {pipeline_mode = #tpu.pipeline_mode<synchronous>, transform_indices = @transform_1, window_bounds = array<i64: 72, 128>}, {pipeline_mode = #tpu.pipeline_mode<synchronous>, transform_indices = @transform_2, window_bounds = array<i64: 1, 128>}, {transform_indices = @transform_3, window_bounds = array<i64: 128, 128>}]} {
    %c0 = arith.constant 0 : index
    %c0_0 = arith.constant 0 : index
    %0 = vector.load %arg1[%c0, %c0_0] : memref<128x72xbf16, #tpu.memory_space<vmem>>, vector<128x72xbf16>
    %c0_1 = arith.constant 0 : index
    %c0_2 = arith.constant 0 : index
    %1 = vector.load %arg2[%c0_1, %c0_2] : memref<72x128xbf16, #tpu.memory_space<vmem>>, vector<72x128xbf16>
    %cst = arith.constant dense<0.000000e+00> : vector<128x128xf32>
    %2 = tpu.matmul %0, %1, %cst {dimension_numbers = #tpu.dot_dimension_numbers<[1], [0], [0], [1], [0, 0, 1, 1], [], []>} : vector<128x72xbf16>, vector<72x128xbf16>, vector<128x128xf32> -> vector<128x128xf32>
    %c0_3 = arith.constant 0 : index
    %c0_4 = arith.constant 0 : index
    %3 = vector.load %arg3[%c0_3, %c0_4] : memref<1x128xf32, #tpu.memory_space<vmem>>, vector<1x128xf32>
    %4 = vector.broadcast %3 : vector<1x128xf32> to vector<128x128xf32>
    %5 = arith.addf %2, %4 : vector<128x128xf32>
    %cst_5 = arith.constant 0.000000e+00 : f32
    %6 = vector.broadcast %cst_5 : f32 to vector<128x128xf32>
    %7 = arith.maximumf %5, %6 : vector<128x128xf32>
    %c0_6 = arith.constant 0 : index
    %c0_7 = arith.constant 0 : index
    %8 = vector.load %arg4[%c0_6, %c0_7] : memref<128x128xf32, #tpu.memory_space<vmem>>, vector<128x128xf32>
    tpu.vector_store %arg4[%c0_6, %c0_7], %7 {strides = array<i32>} : memref<128x128xf32, #tpu.memory_space<vmem>>, vector<128x128xf32>,
    return
  }
  func.func @transform_0(%arg0: i32) -> (i32, i32) {
    %c0_i32 = arith.constant 0 : i32
    %c0_i32_0 = arith.constant 0 : i32
    return %arg0, %c0_i32 : i32, i32
  }
  func.func @transform_1(%arg0: i32) -> (i32, i32) {
    %c0_i32 = arith.constant 0 : i32
    %c0_i32_0 = arith.constant 0 : i32
    %c0_i32_1 = arith.constant 0 : i32
    return %c0_i32, %c0_i32_0 : i32, i32
  }
  func.func @transform_2(%arg0: i32) -> (i32, i32) {
    %c0_i32 = arith.constant 0 : i32
    %c0_i32_0 = arith.constant 0 : i32
    %c0_i32_1 = arith.constant 0 : i32
    return %c0_i32, %c0_i32_0 : i32, i32
  }
  func.func @transform_3(%arg0: i32) -> (i32, i32) {
    %c0_i32 = arith.constant 0 : i32
    %c0_i32_0 = arith.constant 0 : i32
    return %arg0, %c0_i32 : i32, i32
  }
}

module attributes {stable_mosaic.version = 11 : i64} {
  func.func @_conv_mm_kernel(%arg0: i32, %arg1: memref<128x144xbf16, #tpu.memory_space<vmem>>, %arg2: memref<144x128xbf16, #tpu.memory_space<vmem>>, %arg3: memref<1x128xf32, #tpu.memory_space<vmem>>, %arg4: memref<128x128xf32, #tpu.memory_space<vmem>>) attributes {dimension_semantics = [#tpu.dimension_semantics<parallel>], iteration_bounds = array<i64: 1>, scalar_prefetch = 0 : i64, scratch_operands = 0 : i64, tpu.core_type = #tpu.core_type<tc>, window_params = [{transform_indices = @transform_0, window_bounds = array<i64: 128, 144>}, {pipeline_mode = #tpu.pipeline_mode<synchronous>, transform_indices = @transform_1, window_bounds = array<i64: 144, 128>}, {pipeline_mode = #tpu.pipeline_mode<synchronous>, transform_indices = @transform_2, window_bounds = array<i64: 1, 128>}, {transform_indices = @transform_3, window_bounds = array<i64: 128, 128>}]} {
    %c0 = arith.constant 0 : index
    %c0_0 = arith.constant 0 : index
    %0 = vector.load %arg1[%c0, %c0_0] : memref<128x144xbf16, #tpu.memory_space<vmem>>, vector<128x144xbf16>
    %c0_1 = arith.constant 0 : index
    %c0_2 = arith.constant 0 : index
    %1 = vector.load %arg2[%c0_1, %c0_2] : memref<144x128xbf16, #tpu.memory_space<vmem>>, vector<144x128xbf16>
    %cst = arith.constant dense<0.000000e+00> : vector<128x128xf32>
    %2 = tpu.matmul %0, %1, %cst {dimension_numbers = #tpu.dot_dimension_numbers<[1], [0], [0], [1], [0, 0, 1, 1], [], []>} : vector<128x144xbf16>, vector<144x128xbf16>, vector<128x128xf32> -> vector<128x128xf32>
    %c0_3 = arith.constant 0 : index
    %c0_4 = arith.constant 0 : index
    %3 = vector.load %arg3[%c0_3, %c0_4] : memref<1x128xf32, #tpu.memory_space<vmem>>, vector<1x128xf32>
    %4 = vector.broadcast %3 : vector<1x128xf32> to vector<128x128xf32>
    %5 = arith.addf %2, %4 : vector<128x128xf32>
    %cst_5 = arith.constant 0.000000e+00 : f32
    %6 = vector.broadcast %cst_5 : f32 to vector<128x128xf32>
    %7 = arith.maximumf %5, %6 : vector<128x128xf32>
    %c0_6 = arith.constant 0 : index
    %c0_7 = arith.constant 0 : index
    %8 = vector.load %arg4[%c0_6, %c0_7] : memref<128x128xf32, #tpu.memory_space<vmem>>, vector<128x128xf32>
    tpu.vector_store %arg4[%c0_6, %c0_7], %7 {strides = array<i32>} : memref<128x128xf32, #tpu.memory_space<vmem>>, vector<128x128xf32>,
    return
  }
  func.func @transform_0(%arg0: i32) -> (i32, i32) {
    %c0_i32 = arith.constant 0 : i32
    %c0_i32_0 = arith.constant 0 : i32
    return %arg0, %c0_i32 : i32, i32
  }
  func.func @transform_1(%arg0: i32) -> (i32, i32) {
    %c0_i32 = arith.constant 0 : i32
    %c0_i32_0 = arith.constant 0 : i32
    %c0_i32_1 = arith.constant 0 : i32
    return %c0_i32, %c0_i32_0 : i32, i32
  }
  func.func @transform_2(%arg0: i32) -> (i32, i32) {
    %c0_i32 = arith.constant 0 : i32
    %c0_i32_0 = arith.constant 0 : i32
    %c0_i32_1 = arith.constant 0 : i32
    return %c0_i32, %c0_i32_0 : i32, i32
  }
  func.func @transform_3(%arg0: i32) -> (i32, i32) {
    %c0_i32 = arith.constant 0 : i32
    %c0_i32_0 = arith.constant 0 : i32
    return %arg0, %c0_i32 : i32, i32
  }
}

module attributes {stable_mosaic.version = 11 : i64} {
  func.func @_conv_mm_kernel(%arg0: i32, %arg1: memref<32x144xbf16, #tpu.memory_space<vmem>>, %arg2: memref<144x128xbf16, #tpu.memory_space<vmem>>, %arg3: memref<1x128xf32, #tpu.memory_space<vmem>>, %arg4: memref<32x128xf32, #tpu.memory_space<vmem>>) attributes {dimension_semantics = [#tpu.dimension_semantics<parallel>], iteration_bounds = array<i64: 1>, scalar_prefetch = 0 : i64, scratch_operands = 0 : i64, tpu.core_type = #tpu.core_type<tc>, window_params = [{transform_indices = @transform_0, window_bounds = array<i64: 32, 144>}, {pipeline_mode = #tpu.pipeline_mode<synchronous>, transform_indices = @transform_1, window_bounds = array<i64: 144, 128>}, {pipeline_mode = #tpu.pipeline_mode<synchronous>, transform_indices = @transform_2, window_bounds = array<i64: 1, 128>}, {transform_indices = @transform_3, window_bounds = array<i64: 32, 128>}]} {
    %c0 = arith.constant 0 : index
    %c0_0 = arith.constant 0 : index
    %0 = vector.load %arg1[%c0, %c0_0] : memref<32x144xbf16, #tpu.memory_space<vmem>>, vector<32x144xbf16>
    %c0_1 = arith.constant 0 : index
    %c0_2 = arith.constant 0 : index
    %1 = vector.load %arg2[%c0_1, %c0_2] : memref<144x128xbf16, #tpu.memory_space<vmem>>, vector<144x128xbf16>
    %cst = arith.constant dense<0.000000e+00> : vector<32x128xf32>
    %2 = tpu.matmul %0, %1, %cst {dimension_numbers = #tpu.dot_dimension_numbers<[1], [0], [0], [1], [0, 0, 1, 1], [], []>} : vector<32x144xbf16>, vector<144x128xbf16>, vector<32x128xf32> -> vector<32x128xf32>
    %c0_3 = arith.constant 0 : index
    %c0_4 = arith.constant 0 : index
    %3 = vector.load %arg3[%c0_3, %c0_4] : memref<1x128xf32, #tpu.memory_space<vmem>>, vector<1x128xf32>
    %4 = vector.broadcast %3 : vector<1x128xf32> to vector<32x128xf32>
    %5 = arith.addf %2, %4 : vector<32x128xf32>
    %cst_5 = arith.constant 0.000000e+00 : f32
    %6 = vector.broadcast %cst_5 : f32 to vector<32x128xf32>
    %7 = arith.maximumf %5, %6 : vector<32x128xf32>
    %c0_6 = arith.constant 0 : index
    %c0_7 = arith.constant 0 : index
    %8 = vector.load %arg4[%c0_6, %c0_7] : memref<32x128xf32, #tpu.memory_space<vmem>>, vector<32x128xf32>
    tpu.vector_store %arg4[%c0_6, %c0_7], %7 {strides = array<i32>} : memref<32x128xf32, #tpu.memory_space<vmem>>, vector<32x128xf32>,
    return
  }
  func.func @transform_0(%arg0: i32) -> (i32, i32) {
    %c0_i32 = arith.constant 0 : i32
    %c0_i32_0 = arith.constant 0 : i32
    return %arg0, %c0_i32 : i32, i32
  }
  func.func @transform_1(%arg0: i32) -> (i32, i32) {
    %c0_i32 = arith.constant 0 : i32
    %c0_i32_0 = arith.constant 0 : i32
    %c0_i32_1 = arith.constant 0 : i32
    return %c0_i32, %c0_i32_0 : i32, i32
  }
  func.func @transform_2(%arg0: i32) -> (i32, i32) {
    %c0_i32 = arith.constant 0 : i32
    %c0_i32_0 = arith.constant 0 : i32
    %c0_i32_1 = arith.constant 0 : i32
    return %c0_i32, %c0_i32_0 : i32, i32
  }
  func.func @transform_3(%arg0: i32) -> (i32, i32) {
    %c0_i32 = arith.constant 0 : i32
    %c0_i32_0 = arith.constant 0 : i32
    return %arg0, %c0_i32 : i32, i32
  }
}

module attributes {stable_mosaic.version = 11 : i64} {
  func.func @_conv_mm_kernel(%arg0: i32, %arg1: memref<32x288xbf16, #tpu.memory_space<vmem>>, %arg2: memref<288x128xbf16, #tpu.memory_space<vmem>>, %arg3: memref<1x128xf32, #tpu.memory_space<vmem>>, %arg4: memref<32x128xf32, #tpu.memory_space<vmem>>) attributes {dimension_semantics = [#tpu.dimension_semantics<parallel>], iteration_bounds = array<i64: 1>, scalar_prefetch = 0 : i64, scratch_operands = 0 : i64, tpu.core_type = #tpu.core_type<tc>, window_params = [{transform_indices = @transform_0, window_bounds = array<i64: 32, 288>}, {pipeline_mode = #tpu.pipeline_mode<synchronous>, transform_indices = @transform_1, window_bounds = array<i64: 288, 128>}, {pipeline_mode = #tpu.pipeline_mode<synchronous>, transform_indices = @transform_2, window_bounds = array<i64: 1, 128>}, {transform_indices = @transform_3, window_bounds = array<i64: 32, 128>}]} {
    %c0 = arith.constant 0 : index
    %c0_0 = arith.constant 0 : index
    %0 = vector.load %arg1[%c0, %c0_0] : memref<32x288xbf16, #tpu.memory_space<vmem>>, vector<32x288xbf16>
    %c0_1 = arith.constant 0 : index
    %c0_2 = arith.constant 0 : index
    %1 = vector.load %arg2[%c0_1, %c0_2] : memref<288x128xbf16, #tpu.memory_space<vmem>>, vector<288x128xbf16>
    %cst = arith.constant dense<0.000000e+00> : vector<32x128xf32>
    %2 = tpu.matmul %0, %1, %cst {dimension_numbers = #tpu.dot_dimension_numbers<[1], [0], [0], [1], [0, 0, 1, 1], [], []>} : vector<32x288xbf16>, vector<288x128xbf16>, vector<32x128xf32> -> vector<32x128xf32>
    %c0_3 = arith.constant 0 : index
    %c0_4 = arith.constant 0 : index
    %3 = vector.load %arg3[%c0_3, %c0_4] : memref<1x128xf32, #tpu.memory_space<vmem>>, vector<1x128xf32>
    %4 = vector.broadcast %3 : vector<1x128xf32> to vector<32x128xf32>
    %5 = arith.addf %2, %4 : vector<32x128xf32>
    %cst_5 = arith.constant 0.000000e+00 : f32
    %6 = vector.broadcast %cst_5 : f32 to vector<32x128xf32>
    %7 = arith.maximumf %5, %6 : vector<32x128xf32>
    %c0_6 = arith.constant 0 : index
    %c0_7 = arith.constant 0 : index
    %8 = vector.load %arg4[%c0_6, %c0_7] : memref<32x128xf32, #tpu.memory_space<vmem>>, vector<32x128xf32>
    tpu.vector_store %arg4[%c0_6, %c0_7], %7 {strides = array<i32>} : memref<32x128xf32, #tpu.memory_space<vmem>>, vector<32x128xf32>,
    return
  }
  func.func @transform_0(%arg0: i32) -> (i32, i32) {
    %c0_i32 = arith.constant 0 : i32
    %c0_i32_0 = arith.constant 0 : i32
    return %arg0, %c0_i32 : i32, i32
  }
  func.func @transform_1(%arg0: i32) -> (i32, i32) {
    %c0_i32 = arith.constant 0 : i32
    %c0_i32_0 = arith.constant 0 : i32
    %c0_i32_1 = arith.constant 0 : i32
    return %c0_i32, %c0_i32_0 : i32, i32
  }
  func.func @transform_2(%arg0: i32) -> (i32, i32) {
    %c0_i32 = arith.constant 0 : i32
    %c0_i32_0 = arith.constant 0 : i32
    %c0_i32_1 = arith.constant 0 : i32
    return %c0_i32, %c0_i32_0 : i32, i32
  }
  func.func @transform_3(%arg0: i32) -> (i32, i32) {
    %c0_i32 = arith.constant 0 : i32
    %c0_i32_0 = arith.constant 0 : i32
    return %arg0, %c0_i32 : i32, i32
  }
}

module attributes {stable_mosaic.version = 11 : i64} {
  func.func @_conv_mm_kernel(%arg0: i32, %arg1: memref<16x288xbf16, #tpu.memory_space<vmem>>, %arg2: memref<288x128xbf16, #tpu.memory_space<vmem>>, %arg3: memref<1x128xf32, #tpu.memory_space<vmem>>, %arg4: memref<16x128xf32, #tpu.memory_space<vmem>>) attributes {dimension_semantics = [#tpu.dimension_semantics<parallel>], iteration_bounds = array<i64: 1>, scalar_prefetch = 0 : i64, scratch_operands = 0 : i64, tpu.core_type = #tpu.core_type<tc>, window_params = [{transform_indices = @transform_0, window_bounds = array<i64: 16, 288>}, {pipeline_mode = #tpu.pipeline_mode<synchronous>, transform_indices = @transform_1, window_bounds = array<i64: 288, 128>}, {pipeline_mode = #tpu.pipeline_mode<synchronous>, transform_indices = @transform_2, window_bounds = array<i64: 1, 128>}, {transform_indices = @transform_3, window_bounds = array<i64: 16, 128>}]} {
    %c0 = arith.constant 0 : index
    %c0_0 = arith.constant 0 : index
    %0 = vector.load %arg1[%c0, %c0_0] : memref<16x288xbf16, #tpu.memory_space<vmem>>, vector<16x288xbf16>
    %c0_1 = arith.constant 0 : index
    %c0_2 = arith.constant 0 : index
    %1 = vector.load %arg2[%c0_1, %c0_2] : memref<288x128xbf16, #tpu.memory_space<vmem>>, vector<288x128xbf16>
    %cst = arith.constant dense<0.000000e+00> : vector<16x128xf32>
    %2 = tpu.matmul %0, %1, %cst {dimension_numbers = #tpu.dot_dimension_numbers<[1], [0], [0], [1], [0, 0, 1, 1], [], []>} : vector<16x288xbf16>, vector<288x128xbf16>, vector<16x128xf32> -> vector<16x128xf32>
    %c0_3 = arith.constant 0 : index
    %c0_4 = arith.constant 0 : index
    %3 = vector.load %arg3[%c0_3, %c0_4] : memref<1x128xf32, #tpu.memory_space<vmem>>, vector<1x128xf32>
    %4 = vector.broadcast %3 : vector<1x128xf32> to vector<16x128xf32>
    %5 = arith.addf %2, %4 : vector<16x128xf32>
    %cst_5 = arith.constant 0.000000e+00 : f32
    %6 = vector.broadcast %cst_5 : f32 to vector<16x128xf32>
    %7 = arith.maximumf %5, %6 : vector<16x128xf32>
    %c0_6 = arith.constant 0 : index
    %c0_7 = arith.constant 0 : index
    %8 = vector.load %arg4[%c0_6, %c0_7] : memref<16x128xf32, #tpu.memory_space<vmem>>, vector<16x128xf32>
    tpu.vector_store %arg4[%c0_6, %c0_7], %7 {strides = array<i32>} : memref<16x128xf32, #tpu.memory_space<vmem>>, vector<16x128xf32>,
    return
  }
  func.func @transform_0(%arg0: i32) -> (i32, i32) {
    %c0_i32 = arith.constant 0 : i32
    %c0_i32_0 = arith.constant 0 : i32
    return %arg0, %c0_i32 : i32, i32
  }
  func.func @transform_1(%arg0: i32) -> (i32, i32) {
    %c0_i32 = arith.constant 0 : i32
    %c0_i32_0 = arith.constant 0 : i32
    %c0_i32_1 = arith.constant 0 : i32
    return %c0_i32, %c0_i32_0 : i32, i32
  }
  func.func @transform_2(%arg0: i32) -> (i32, i32) {
    %c0_i32 = arith.constant 0 : i32
    %c0_i32_0 = arith.constant 0 : i32
    %c0_i32_1 = arith.constant 0 : i32
    return %c0_i32, %c0_i32_0 : i32, i32
  }
  func.func @transform_3(%arg0: i32) -> (i32, i32) {
    %c0_i32 = arith.constant 0 : i32
    %c0_i32_0 = arith.constant 0 : i32
    return %arg0, %c0_i32 : i32, i32
  }
}

module attributes {stable_mosaic.version = 11 : i64} {
  func.func @_conv_mm_kernel(%arg0: i32, %arg1: memref<16x576xbf16, #tpu.memory_space<vmem>>, %arg2: memref<576x128xbf16, #tpu.memory_space<vmem>>, %arg3: memref<1x128xf32, #tpu.memory_space<vmem>>, %arg4: memref<16x128xf32, #tpu.memory_space<vmem>>) attributes {dimension_semantics = [#tpu.dimension_semantics<parallel>], iteration_bounds = array<i64: 1>, scalar_prefetch = 0 : i64, scratch_operands = 0 : i64, tpu.core_type = #tpu.core_type<tc>, window_params = [{transform_indices = @transform_0, window_bounds = array<i64: 16, 576>}, {pipeline_mode = #tpu.pipeline_mode<synchronous>, transform_indices = @transform_1, window_bounds = array<i64: 576, 128>}, {pipeline_mode = #tpu.pipeline_mode<synchronous>, transform_indices = @transform_2, window_bounds = array<i64: 1, 128>}, {transform_indices = @transform_3, window_bounds = array<i64: 16, 128>}]} {
    %c0 = arith.constant 0 : index
    %c0_0 = arith.constant 0 : index
    %0 = vector.load %arg1[%c0, %c0_0] : memref<16x576xbf16, #tpu.memory_space<vmem>>, vector<16x576xbf16>
    %c0_1 = arith.constant 0 : index
    %c0_2 = arith.constant 0 : index
    %1 = vector.load %arg2[%c0_1, %c0_2] : memref<576x128xbf16, #tpu.memory_space<vmem>>, vector<576x128xbf16>
    %cst = arith.constant dense<0.000000e+00> : vector<16x128xf32>
    %2 = tpu.matmul %0, %1, %cst {dimension_numbers = #tpu.dot_dimension_numbers<[1], [0], [0], [1], [0, 0, 1, 1], [], []>} : vector<16x576xbf16>, vector<576x128xbf16>, vector<16x128xf32> -> vector<16x128xf32>
    %c0_3 = arith.constant 0 : index
    %c0_4 = arith.constant 0 : index
    %3 = vector.load %arg3[%c0_3, %c0_4] : memref<1x128xf32, #tpu.memory_space<vmem>>, vector<1x128xf32>
    %4 = vector.broadcast %3 : vector<1x128xf32> to vector<16x128xf32>
    %5 = arith.addf %2, %4 : vector<16x128xf32>
    %cst_5 = arith.constant 0.000000e+00 : f32
    %6 = vector.broadcast %cst_5 : f32 to vector<16x128xf32>
    %7 = arith.maximumf %5, %6 : vector<16x128xf32>
    %c0_6 = arith.constant 0 : index
    %c0_7 = arith.constant 0 : index
    %8 = vector.load %arg4[%c0_6, %c0_7] : memref<16x128xf32, #tpu.memory_space<vmem>>, vector<16x128xf32>
    tpu.vector_store %arg4[%c0_6, %c0_7], %7 {strides = array<i32>} : memref<16x128xf32, #tpu.memory_space<vmem>>, vector<16x128xf32>,
    return
  }
  func.func @transform_0(%arg0: i32) -> (i32, i32) {
    %c0_i32 = arith.constant 0 : i32
    %c0_i32_0 = arith.constant 0 : i32
    return %arg0, %c0_i32 : i32, i32
  }
  func.func @transform_1(%arg0: i32) -> (i32, i32) {
    %c0_i32 = arith.constant 0 : i32
    %c0_i32_0 = arith.constant 0 : i32
    %c0_i32_1 = arith.constant 0 : i32
    return %c0_i32, %c0_i32_0 : i32, i32
  }
  func.func @transform_2(%arg0: i32) -> (i32, i32) {
    %c0_i32 = arith.constant 0 : i32
    %c0_i32_0 = arith.constant 0 : i32
    %c0_i32_1 = arith.constant 0 : i32
    return %c0_i32, %c0_i32_0 : i32, i32
  }
  func.func @transform_3(%arg0: i32) -> (i32, i32) {
    %c0_i32 = arith.constant 0 : i32
    %c0_i32_0 = arith.constant 0 : i32
    return %arg0, %c0_i32 : i32, i32
  }
}

</mosaic_0001>

<bundles_post_ra>
// kernel: _lambda_.8
= control target key start
LH: loop header
LB: loop body
LE: loop exit
PB: predicated region body
PF: predicated region fallthrough
CT: control target
= control target key end

     0   :  { %vm363_vm0 = vcmask 1041408   ;;  %vm266_vm1 = vcmask 293888   ;;  %s1422_s1 = inlined_call_operand.vmem [shape: bf16[36,128], index: 1, kind: input, shape index: {}]   ;;  %s1423_s0 = inlined_call_operand.vmem [shape: bf16[512,36], index: 0, kind: input, shape index: {}]   ;;  %s1424_s2 = inlined_call_operand.vmem [shape: f32[1,128], index: 2, kind: input, shape index: {}]   ;;  %s1425_s3 = inlined_call_operand.vmem [shape: f32[512,128], index: 3, kind: output, shape index: {}]  }
   0x1   :  { %v969_v0 = vld [vmem:[%s1422_s1 + $0x10] ss:$0 sps:$4 sm:$0x33]   ;;  %v970_v1 = vld [vmem:[%s1422_s1 + $0x8] sm:$0xff]   ;;  %v971_v3 = vld [vmem:[%s1422_s1] sm:$0xff]  }
   0x2   :  { %967 = vmatprep.subr.msk.bf16.mxu0 %vm363_vm0, %v969_v0  ;;  %968 = vmatprep.subr.msk.bf16.mxu1 %vm363_vm0, %v969_v0  ;;  %v365_v2 = vsel %vm363_vm0, %v969_v0, 0  ;;  %v972_v4 = vld [vmem:[%s1423_s0] sm:$0xff]   ;;  %v974_v6 = vld [vmem:[%s1423_s0 + $0x8] sm:$0xff]   ;;  %v976_v8 = vld [vmem:[%s1423_s0 + $0x10] sm:$0xff]  }
   0x3   :  { %892 = vmatpush3.bf16.msra.mxu0 %v365_v2  ;;  %964 = vmatpush3.bf16.msra.mxu1 %v365_v2  ;;  %v973_v5 = vld [vmem:[%s1423_s0 + $0x80] sm:$0xff]   ;;  %v975_v7 = vld [vmem:[%s1423_s0 + $0x88] sm:$0xff]   ;;  %v977_v9 = vld [vmem:[%s1423_s0 + $0x90] sm:$0xff]  }
   0x4   :  { %893 = vmatprep.subr.bf16.mxu0 %v970_v1  ;;  %962 = vmatprep.subr.bf16.mxu1 %v970_v1  ;;  %v978_v10 = vld [vmem:[%s1423_s0 + $0x18] sm:$0xff]   ;;  %v980_v12 = vld [vmem:[%s1423_s0 + $0x20] sm:$0xff]   ;;  %v982_v14 = vld [vmem:[%s1423_s0 + $0x28] sm:$0xff]  }
   0x5   :  { %897 = vmatprep.mubr.msk.bf16.mxu0 %vm266_vm1, %v972_v4  ;;  %929 = vmatprep.mubr.msk.bf16.mxu1 %vm266_vm1, %v973_v5  ;;  %v979_v11 = vld [vmem:[%s1423_s0 + $0x98] sm:$0xff]   ;;  %v981_v13 = vld [vmem:[%s1423_s0 + $0xa0] sm:$0xff]   ;;  %v983_v15 = vld [vmem:[%s1423_s0 + $0xa8] sm:$0xff]  }
   0x6   :  { %v984_v16 = vld [vmem:[%s1423_s0 + $0x30] sm:$0xff]   ;;  %v986_v18 = vld [vmem:[%s1423_s0 + $0x38] sm:$0xff]   ;;  %v988_v20 = vld [vmem:[%s1423_s0 + $0x40] sm:$0xff]  }
   0x7   :  { %894 = vmatpush3.bf16.msra.mxu0 %v970_v1  ;;  %965 = vmatpush3.bf16.msra.mxu1 %v970_v1  ;;  %v985_v17 = vld [vmem:[%s1423_s0 + $0xb0] sm:$0xff]   ;;  %v987_v19 = vld [vmem:[%s1423_s0 + $0xb8] sm:$0xff]   ;;  %v989_v21 = vld [vmem:[%s1423_s0 + $0xc0] sm:$0xff]  }
   0x8   :  { %895 = vmatprep.subr.bf16.mxu0 %v971_v3  ;;  %963 = vmatprep.subr.bf16.mxu1 %v971_v3  ;;  %v990_v22 = vld [vmem:[%s1423_s0 + $0x48] sm:$0xff]   ;;  %v992_v24 = vld [vmem:[%s1423_s0 + $0x50] sm:$0xff]   ;;  %v994_v26 = vld [vmem:[%s1423_s0 + $0x58] sm:$0xff]  }
   0x9   :  { %v991_v23 = vld [vmem:[%s1423_s0 + $0xc8] sm:$0xff]   ;;  %v993_v25 = vld [vmem:[%s1423_s0 + $0xd0] sm:$0xff]   ;;  %v995_v27 = vld [vmem:[%s1423_s0 + $0xd8] sm:$0xff]  }
   0xa   :  { %v996_v28 = vld [vmem:[%s1423_s0 + $0x60] sm:$0xff]   ;;  %v998_v30 = vld [vmem:[%s1423_s0 + $0x68] sm:$0xff]   ;;  %v1000_v32 = vld [vmem:[%s1423_s0 + $0x70] sm:$0xff]  }
   0xb   :  { %896 = vmatpush3.bf16.msra.mxu0 %v971_v3  ;;  %966 = vmatpush3.bf16.msra.mxu1 %v971_v3  ;;  %v997_v29 = vld [vmem:[%s1423_s0 + $0xe0] sm:$0xff]   ;;  %v999_v31 = vld [vmem:[%s1423_s0 + $0xe8] sm:$0xff]   ;;  %v1001_v33 = vld [vmem:[%s1423_s0 + $0xf0] sm:$0xff]  }
   0xc   :  { %v1002_v34 = vld [vmem:[%s1423_s0 + $0x78] sm:$0xff]   ;;  %v1164_v36 = vld [vmem:[%s1424_s2] ss:$0 sm:$0xff] }
   0xd   :  { %v1003_v35 = vld [vmem:[%s1423_s0 + $0xf8] sm:$0xff]  }
   0xe   :  { %898 = vmatmul.mubr.msk.bf16.vlgmr.msra.gmra.mxu0 %vm266_vm1, %v974_v6  ;;  %930 = vmatmul.mubr.msk.bf16.vlgmr.msra.gmra.mxu1 %vm266_vm1, %v975_v7 }
   0xf   :  { %901 = vmatprep.mubr.msk.bf16.mxu0 %vm266_vm1, %v976_v8  ;;  %933 = vmatprep.mubr.msk.bf16.mxu1 %vm266_vm1, %v977_v9 }
  0x16   :  { %902 = vmatmul.mubr.msk.bf16.gmra.mxu0 %vm266_vm1, %v978_v10  ;;  %934 = vmatmul.mubr.msk.bf16.gmra.mxu1 %vm266_vm1, %v979_v11 }
  0x17   :  { %905 = vmatprep.mubr.msk.bf16.mxu0 %vm266_vm1, %v980_v12  ;;  %937 = vmatprep.mubr.msk.bf16.mxu1 %vm266_vm1, %v981_v13 }
  0x1e   :  { %906 = vmatmul.mubr.msk.bf16.gmra.mxu0 %vm266_vm1, %v982_v14  ;;  %938 = vmatmul.mubr.msk.bf16.gmra.mxu1 %vm266_vm1, %v983_v15 }
  0x1f   :  { %909 = vmatprep.mubr.msk.bf16.mxu0 %vm266_vm1, %v984_v16  ;;  %941 = vmatprep.mubr.msk.bf16.mxu1 %vm266_vm1, %v985_v17 }
  0x26   :  { %910 = vmatmul.mubr.msk.bf16.gmra.mxu0 %vm266_vm1, %v986_v18  ;;  %942 = vmatmul.mubr.msk.bf16.gmra.mxu1 %vm266_vm1, %v987_v19 }
  0x27   :  { %913 = vmatprep.mubr.msk.bf16.mxu0 %vm266_vm1, %v988_v20  ;;  %945 = vmatprep.mubr.msk.bf16.mxu1 %vm266_vm1, %v989_v21 }
  0x2e   :  { %914 = vmatmul.mubr.msk.bf16.gmra.mxu0 %vm266_vm1, %v990_v22  ;;  %946 = vmatmul.mubr.msk.bf16.gmra.mxu1 %vm266_vm1, %v991_v23 }
  0x2f   :  { %917 = vmatprep.mubr.msk.bf16.mxu0 %vm266_vm1, %v992_v24  ;;  %949 = vmatprep.mubr.msk.bf16.mxu1 %vm266_vm1, %v993_v25 }
  0x36   :  { %918 = vmatmul.mubr.msk.bf16.gmra.mxu0 %vm266_vm1, %v994_v26  ;;  %950 = vmatmul.mubr.msk.bf16.gmra.mxu1 %vm266_vm1, %v995_v27 }
  0x37   :  { %921 = vmatprep.mubr.msk.bf16.mxu0 %vm266_vm1, %v996_v28  ;;  %953 = vmatprep.mubr.msk.bf16.mxu1 %vm266_vm1, %v997_v29 }
  0x3e   :  { %922 = vmatmul.mubr.msk.bf16.gmra.mxu0 %vm266_vm1, %v998_v30  ;;  %954 = vmatmul.mubr.msk.bf16.gmra.mxu1 %vm266_vm1, %v999_v31 }
  0x3f   :  { %925 = vmatprep.mubr.msk.bf16.mxu0 %vm266_vm1, %v1000_v32  ;;  %957 = vmatprep.mubr.msk.bf16.mxu1 %vm266_vm1, %v1001_v33 }
  0x46   :  { %926 = vmatmul.mubr.msk.bf16.gmra.mxu0 %vm266_vm1, %v1002_v34  ;;  %958 = vmatmul.mubr.msk.bf16.gmra.mxu1 %vm266_vm1, %v1003_v35 }
  0xce   :  { %v899_v37 = vpop.f32.mrf.mxu0  ;;  %v931_v38 = vpop.f32.mrf.mxu1 }
  0xcf   :  { %v410_v39 = vadd.f32 %v899_v37, %v1164_v36  ;;  %v538_v40 = vadd.f32 %v931_v38, %v1164_v36 }
  0xd0   :  { %v401_v41 = vpop.f32.mrf.mxu0  ;;  %v529_v42 = vpop.f32.mrf.mxu1 }
  0xd1   :  { %v658_v43 = vmax.f32 %v410_v39, 0.0  ;;  %v690_v44 = vmax.f32 %v538_v40, 0.0  ;;  %v402_v45 = vadd.f32 %v1164_v36, %v401_v41  ;;  %v530_v46 = vadd.f32 %v1164_v36, %v529_v42 }
  0xd2   :  { %v900_v47 = vpop.f32.mrf.mxu0  ;;  %v932_v48 = vpop.f32.mrf.mxu1 }
  0xd3   :  { %722 = vst [vmem:[%s1425_s3 + $0x10] sm:$0xff] %v658_v43  ;;  %754 = vst [vmem:[%s1425_s3 + $0x110] sm:$0xff] %v690_v44  ;;  %v656_v49 = vmax.f32 %v402_v45, 0.0  ;;  %v688_v50 = vmax.f32 %v530_v46, 0.0  ;;  %v413_v51 = vadd.f32 %v900_v47, %v1164_v36  ;;  %v541_v52 = vadd.f32 %v932_v48, %v1164_v36 }
  0xd4   :  { %v404_v53 = vpop.f32.mrf.mxu0  ;;  %v532_v54 = vpop.f32.mrf.mxu1 }
  0xd5   :  { %720 = vst [vmem:[%s1425_s3] sm:$0xff] %v656_v49  ;;  %752 = vst [vmem:[%s1425_s3 + $0x100] sm:$0xff] %v688_v50  ;;  %v659_v55 = vmax.f32 %v413_v51, 0.0  ;;  %v691_v56 = vmax.f32 %v541_v52, 0.0  ;;  %v405_v57 = vadd.f32 %v1164_v36, %v404_v53  ;;  %v533_v58 = vadd.f32 %v1164_v36, %v532_v54 }
  0xd6   :  { %v903_v59 = vpop.f32.mrf.mxu0  ;;  %v935_v60 = vpop.f32.mrf.mxu1 }
  0xd7   :  { %723 = vst [vmem:[%s1425_s3 + $0x18] sm:$0xff] %v659_v55  ;;  %755 = vst [vmem:[%s1425_s3 + $0x118] sm:$0xff] %v691_v56  ;;  %v657_v61 = vmax.f32 %v405_v57, 0.0  ;;  %v689_v62 = vmax.f32 %v533_v58, 0.0  ;;  %v426_v63 = vadd.f32 %v903_v59, %v1164_v36  ;;  %v554_v0 = vadd.f32 %v935_v60, %v1164_v36 }
  0xd8   :  { %v417_v1 = vpop.f32.mrf.mxu0  ;;  %v545_v2 = vpop.f32.mrf.mxu1 }
  0xd9   :  { %721 = vst [vmem:[%s1425_s3 + $0x8] sm:$0xff] %v657_v61  ;;  %753 = vst [vmem:[%s1425_s3 + $0x108] sm:$0xff] %v689_v62  ;;  %v662_v3 = vmax.f32 %v426_v63, 0.0  ;;  %v694_v4 = vmax.f32 %v554_v0, 0.0  ;;  %v418_v5 = vadd.f32 %v1164_v36, %v417_v1  ;;  %v546_v6 = vadd.f32 %v1164_v36, %v545_v2 }
  0xda   :  { %v904_v7 = vpop.f32.mrf.mxu0  ;;  %v936_v8 = vpop.f32.mrf.mxu1 }
  0xdb   :  { %726 = vst [vmem:[%s1425_s3 + $0x30] sm:$0xff] %v662_v3  ;;  %758 = vst [vmem:[%s1425_s3 + $0x130] sm:$0xff] %v694_v4  ;;  %v660_v9 = vmax.f32 %v418_v5, 0.0  ;;  %v692_v10 = vmax.f32 %v546_v6, 0.0  ;;  %v429_v11 = vadd.f32 %v904_v7, %v1164_v36  ;;  %v557_v12 = vadd.f32 %v936_v8, %v1164_v36 }
  0xdc   :  { %v420_v13 = vpop.f32.mrf.mxu0  ;;  %v548_v14 = vpop.f32.mrf.mxu1 }
  0xdd   :  { %724 = vst [vmem:[%s1425_s3 + $0x20] sm:$0xff] %v660_v9  ;;  %756 = vst [vmem:[%s1425_s3 + $0x120] sm:$0xff] %v692_v10  ;;  %v663_v15 = vmax.f32 %v429_v11, 0.0  ;;  %v695_v16 = vmax.f32 %v557_v12, 0.0  ;;  %v421_v17 = vadd.f32 %v1164_v36, %v420_v13  ;;  %v549_v18 = vadd.f32 %v1164_v36, %v548_v14 }
  0xde   :  { %v907_v19 = vpop.f32.mrf.mxu0  ;;  %v939_v20 = vpop.f32.mrf.mxu1 }
  0xdf   :  { %727 = vst [vmem:[%s1425_s3 + $0x38] sm:$0xff] %v663_v15  ;;  %759 = vst [vmem:[%s1425_s3 + $0x138] sm:$0xff] %v695_v16  ;;  %v661_v21 = vmax.f32 %v421_v17, 0.0  ;;  %v693_v22 = vmax.f32 %v549_v18, 0.0  ;;  %v442_v23 = vadd.f32 %v907_v19, %v1164_v36  ;;  %v570_v24 = vadd.f32 %v939_v20, %v1164_v36 }
  0xe0   :  { %v433_v25 = vpop.f32.mrf.mxu0  ;;  %v561_v26 = vpop.f32.mrf.mxu1 }
  0xe1   :  { %725 = vst [vmem:[%s1425_s3 + $0x28] sm:$0xff] %v661_v21  ;;  %757 = vst [vmem:[%s1425_s3 + $0x128] sm:$0xff] %v693_v22  ;;  %v666_v27 = vmax.f32 %v442_v23, 0.0  ;;  %v698_v28 = vmax.f32 %v570_v24, 0.0  ;;  %v434_v29 = vadd.f32 %v1164_v36, %v433_v25  ;;  %v562_v30 = vadd.f32 %v1164_v36, %v561_v26 }
  0xe2   :  { %v908_v31 = vpop.f32.mrf.mxu0  ;;  %v940_v32 = vpop.f32.mrf.mxu1 }
  0xe3   :  { %730 = vst [vmem:[%s1425_s3 + $0x50] sm:$0xff] %v666_v27  ;;  %762 = vst [vmem:[%s1425_s3 + $0x150] sm:$0xff] %v698_v28  ;;  %v664_v33 = vmax.f32 %v434_v29, 0.0  ;;  %v696_v34 = vmax.f32 %v562_v30, 0.0  ;;  %v445_v35 = vadd.f32 %v908_v31, %v1164_v36  ;;  %v573_v37 = vadd.f32 %v940_v32, %v1164_v36 }
  0xe4   :  { %v436_v38 = vpop.f32.mrf.mxu0  ;;  %v564_v39 = vpop.f32.mrf.mxu1 }
  0xe5   :  { %728 = vst [vmem:[%s1425_s3 + $0x40] sm:$0xff] %v664_v33  ;;  %760 = vst [vmem:[%s1425_s3 + $0x140] sm:$0xff] %v696_v34  ;;  %v667_v40 = vmax.f32 %v445_v35, 0.0  ;;  %v699_v41 = vmax.f32 %v573_v37, 0.0  ;;  %v437_v42 = vadd.f32 %v1164_v36, %v436_v38  ;;  %v565_v43 = vadd.f32 %v1164_v36, %v564_v39 }
  0xe6   :  { %v911_v44 = vpop.f32.mrf.mxu0  ;;  %v943_v45 = vpop.f32.mrf.mxu1 }
  0xe7   :  { %731 = vst [vmem:[%s1425_s3 + $0x58] sm:$0xff] %v667_v40  ;;  %763 = vst [vmem:[%s1425_s3 + $0x158] sm:$0xff] %v699_v41  ;;  %v665_v46 = vmax.f32 %v437_v42, 0.0  ;;  %v697_v47 = vmax.f32 %v565_v43, 0.0  ;;  %v458_v48 = vadd.f32 %v911_v44, %v1164_v36  ;;  %v586_v49 = vadd.f32 %v943_v45, %v1164_v36 }
  0xe8   :  { %v449_v50 = vpop.f32.mrf.mxu0  ;;  %v577_v51 = vpop.f32.mrf.mxu1 }
  0xe9   :  { %729 = vst [vmem:[%s1425_s3 + $0x48] sm:$0xff] %v665_v46  ;;  %761 = vst [vmem:[%s1425_s3 + $0x148] sm:$0xff] %v697_v47  ;;  %v670_v52 = vmax.f32 %v458_v48, 0.0  ;;  %v702_v53 = vmax.f32 %v586_v49, 0.0  ;;  %v450_v54 = vadd.f32 %v1164_v36, %v449_v50  ;;  %v578_v55 = vadd.f32 %v1164_v36, %v577_v51 }
  0xea   :  { %v912_v56 = vpop.f32.mrf.mxu0  ;;  %v944_v57 = vpop.f32.mrf.mxu1 }
  0xeb   :  { %734 = vst [vmem:[%s1425_s3 + $0x70] sm:$0xff] %v670_v52  ;;  %766 = vst [vmem:[%s1425_s3 + $0x170] sm:$0xff] %v702_v53  ;;  %v668_v58 = vmax.f32 %v450_v54, 0.0  ;;  %v700_v59 = vmax.f32 %v578_v55, 0.0  ;;  %v461_v60 = vadd.f32 %v912_v56, %v1164_v36  ;;  %v589_v61 = vadd.f32 %v944_v57, %v1164_v36 }
  0xec   :  { %v452_v62 = vpop.f32.mrf.mxu0  ;;  %v580_v63 = vpop.f32.mrf.mxu1 }
  0xed   :  { %732 = vst [vmem:[%s1425_s3 + $0x60] sm:$0xff] %v668_v58  ;;  %764 = vst [vmem:[%s1425_s3 + $0x160] sm:$0xff] %v700_v59  ;;  %v671_v0 = vmax.f32 %v461_v60, 0.0  ;;  %v703_v1 = vmax.f32 %v589_v61, 0.0  ;;  %v453_v2 = vadd.f32 %v1164_v36, %v452_v62  ;;  %v581_v3 = vadd.f32 %v1164_v36, %v580_v63 }
  0xee   :  { %v915_v4 = vpop.f32.mrf.mxu0  ;;  %v947_v5 = vpop.f32.mrf.mxu1 }
  0xef   :  { %735 = vst [vmem:[%s1425_s3 + $0x78] sm:$0xff] %v671_v0  ;;  %767 = vst [vmem:[%s1425_s3 + $0x178] sm:$0xff] %v703_v1  ;;  %v669_v6 = vmax.f32 %v453_v2, 0.0  ;;  %v701_v7 = vmax.f32 %v581_v3, 0.0  ;;  %v474_v8 = vadd.f32 %v915_v4, %v1164_v36  ;;  %v602_v9 = vadd.f32 %v947_v5, %v1164_v36 }
  0xf0   :  { %v465_v10 = vpop.f32.mrf.mxu0  ;;  %v593_v11 = vpop.f32.mrf.mxu1 }
  0xf1   :  { %733 = vst [vmem:[%s1425_s3 + $0x68] sm:$0xff] %v669_v6  ;;  %765 = vst [vmem:[%s1425_s3 + $0x168] sm:$0xff] %v701_v7  ;;  %v674_v12 = vmax.f32 %v474_v8, 0.0  ;;  %v706_v13 = vmax.f32 %v602_v9, 0.0  ;;  %v466_v14 = vadd.f32 %v1164_v36, %v465_v10  ;;  %v594_v15 = vadd.f32 %v1164_v36, %v593_v11 }
  0xf2   :  { %v916_v16 = vpop.f32.mrf.mxu0  ;;  %v948_v17 = vpop.f32.mrf.mxu1 }
  0xf3   :  { %738 = vst [vmem:[%s1425_s3 + $0x90] sm:$0xff] %v674_v12  ;;  %770 = vst [vmem:[%s1425_s3 + $0x190] sm:$0xff] %v706_v13  ;;  %v672_v18 = vmax.f32 %v466_v14, 0.0  ;;  %v704_v19 = vmax.f32 %v594_v15, 0.0  ;;  %v477_v20 = vadd.f32 %v916_v16, %v1164_v36  ;;  %v605_v21 = vadd.f32 %v948_v17, %v1164_v36 }
  0xf4   :  { %v468_v22 = vpop.f32.mrf.mxu0  ;;  %v596_v23 = vpop.f32.mrf.mxu1 }
  0xf5   :  { %736 = vst [vmem:[%s1425_s3 + $0x80] sm:$0xff] %v672_v18  ;;  %768 = vst [vmem:[%s1425_s3 + $0x180] sm:$0xff] %v704_v19  ;;  %v675_v24 = vmax.f32 %v477_v20, 0.0  ;;  %v707_v25 = vmax.f32 %v605_v21, 0.0  ;;  %v469_v26 = vadd.f32 %v1164_v36, %v468_v22  ;;  %v597_v27 = vadd.f32 %v1164_v36, %v596_v23 }
  0xf6   :  { %v919_v28 = vpop.f32.mrf.mxu0  ;;  %v951_v29 = vpop.f32.mrf.mxu1 }
  0xf7   :  { %739 = vst [vmem:[%s1425_s3 + $0x98] sm:$0xff] %v675_v24  ;;  %771 = vst [vmem:[%s1425_s3 + $0x198] sm:$0xff] %v707_v25  ;;  %v673_v30 = vmax.f32 %v469_v26, 0.0  ;;  %v705_v31 = vmax.f32 %v597_v27, 0.0  ;;  %v490_v32 = vadd.f32 %v919_v28, %v1164_v36  ;;  %v618_v33 = vadd.f32 %v951_v29, %v1164_v36 }
  0xf8   :  { %v481_v34 = vpop.f32.mrf.mxu0  ;;  %v609_v35 = vpop.f32.mrf.mxu1 }
  0xf9   :  { %737 = vst [vmem:[%s1425_s3 + $0x88] sm:$0xff] %v673_v30  ;;  %769 = vst [vmem:[%s1425_s3 + $0x188] sm:$0xff] %v705_v31  ;;  %v678_v37 = vmax.f32 %v490_v32, 0.0  ;;  %v710_v38 = vmax.f32 %v618_v33, 0.0  ;;  %v482_v39 = vadd.f32 %v1164_v36, %v481_v34  ;;  %v610_v40 = vadd.f32 %v1164_v36, %v609_v35 }
  0xfa   :  { %v920_v41 = vpop.f32.mrf.mxu0  ;;  %v952_v42 = vpop.f32.mrf.mxu1 }
  0xfb   :  { %742 = vst [vmem:[%s1425_s3 + $0xb0] sm:$0xff] %v678_v37  ;;  %774 = vst [vmem:[%s1425_s3 + $0x1b0] sm:$0xff] %v710_v38  ;;  %v676_v43 = vmax.f32 %v482_v39, 0.0  ;;  %v708_v44 = vmax.f32 %v610_v40, 0.0  ;;  %v493_v45 = vadd.f32 %v920_v41, %v1164_v36  ;;  %v621_v46 = vadd.f32 %v952_v42, %v1164_v36 }
  0xfc   :  { %v484_v47 = vpop.f32.mrf.mxu0  ;;  %v612_v48 = vpop.f32.mrf.mxu1 }
  0xfd   :  { %740 = vst [vmem:[%s1425_s3 + $0xa0] sm:$0xff] %v676_v43  ;;  %772 = vst [vmem:[%s1425_s3 + $0x1a0] sm:$0xff] %v708_v44  ;;  %v679_v49 = vmax.f32 %v493_v45, 0.0  ;;  %v711_v50 = vmax.f32 %v621_v46, 0.0  ;;  %v485_v51 = vadd.f32 %v1164_v36, %v484_v47  ;;  %v613_v52 = vadd.f32 %v1164_v36, %v612_v48 }
  0xfe   :  { %v923_v53 = vpop.f32.mrf.mxu0  ;;  %v955_v54 = vpop.f32.mrf.mxu1 }
  0xff   :  { %743 = vst [vmem:[%s1425_s3 + $0xb8] sm:$0xff] %v679_v49  ;;  %775 = vst [vmem:[%s1425_s3 + $0x1b8] sm:$0xff] %v711_v50  ;;  %v677_v55 = vmax.f32 %v485_v51, 0.0  ;;  %v709_v56 = vmax.f32 %v613_v52, 0.0  ;;  %v506_v57 = vadd.f32 %v923_v53, %v1164_v36  ;;  %v634_v58 = vadd.f32 %v955_v54, %v1164_v36 }
 0x100   :  { %v497_v59 = vpop.f32.mrf.mxu0  ;;  %v625_v60 = vpop.f32.mrf.mxu1 }
 0x101   :  { %741 = vst [vmem:[%s1425_s3 + $0xa8] sm:$0xff] %v677_v55  ;;  %773 = vst [vmem:[%s1425_s3 + $0x1a8] sm:$0xff] %v709_v56  ;;  %v682_v61 = vmax.f32 %v506_v57, 0.0  ;;  %v714_v62 = vmax.f32 %v634_v58, 0.0  ;;  %v498_v63 = vadd.f32 %v1164_v36, %v497_v59  ;;  %v626_v0 = vadd.f32 %v1164_v36, %v625_v60 }
 0x102   :  { %v924_v1 = vpop.f32.mrf.mxu0  ;;  %v956_v2 = vpop.f32.mrf.mxu1 }
 0x103   :  { %746 = vst [vmem:[%s1425_s3 + $0xd0] sm:$0xff] %v682_v61  ;;  %778 = vst [vmem:[%s1425_s3 + $0x1d0] sm:$0xff] %v714_v62  ;;  %v680_v3 = vmax.f32 %v498_v63, 0.0  ;;  %v712_v4 = vmax.f32 %v626_v0, 0.0  ;;  %v509_v5 = vadd.f32 %v924_v1, %v1164_v36  ;;  %v637_v6 = vadd.f32 %v956_v2, %v1164_v36 }
 0x104   :  { %v500_v7 = vpop.f32.mrf.mxu0  ;;  %v628_v8 = vpop.f32.mrf.mxu1 }
 0x105   :  { %744 = vst [vmem:[%s1425_s3 + $0xc0] sm:$0xff] %v680_v3  ;;  %776 = vst [vmem:[%s1425_s3 + $0x1c0] sm:$0xff] %v712_v4  ;;  %v683_v9 = vmax.f32 %v509_v5, 0.0  ;;  %v715_v10 = vmax.f32 %v637_v6, 0.0  ;;  %v501_v11 = vadd.f32 %v1164_v36, %v500_v7  ;;  %v629_v12 = vadd.f32 %v1164_v36, %v628_v8 }
 0x106   :  { %v927_v13 = vpop.f32.mrf.mxu0  ;;  %v959_v14 = vpop.f32.mrf.mxu1 }
 0x107   :  { %747 = vst [vmem:[%s1425_s3 + $0xd8] sm:$0xff] %v683_v9  ;;  %779 = vst [vmem:[%s1425_s3 + $0x1d8] sm:$0xff] %v715_v10  ;;  %v681_v15 = vmax.f32 %v501_v11, 0.0  ;;  %v713_v16 = vmax.f32 %v629_v12, 0.0  ;;  %v522_v17 = vadd.f32 %v927_v13, %v1164_v36  ;;  %v650_v18 = vadd.f32 %v959_v14, %v1164_v36 }
 0x108   :  { %v513_v19 = vpop.f32.mrf.mxu0  ;;  %v641_v20 = vpop.f32.mrf.mxu1 }
 0x109   :  { %745 = vst [vmem:[%s1425_s3 + $0xc8] sm:$0xff] %v681_v15  ;;  %777 = vst [vmem:[%s1425_s3 + $0x1c8] sm:$0xff] %v713_v16  ;;  %v686_v21 = vmax.f32 %v522_v17, 0.0  ;;  %v718_v22 = vmax.f32 %v650_v18, 0.0  ;;  %v514_v23 = vadd.f32 %v1164_v36, %v513_v19  ;;  %v642_v24 = vadd.f32 %v1164_v36, %v641_v20 }
 0x10a   :  { %v928_v25 = vpop.f32.mrf.mxu0  ;;  %v960_v26 = vpop.f32.mrf.mxu1 }
 0x10b   :  { %750 = vst [vmem:[%s1425_s3 + $0xf0] sm:$0xff] %v686_v21  ;;  %782 = vst [vmem:[%s1425_s3 + $0x1f0] sm:$0xff] %v718_v22  ;;  %v684_v27 = vmax.f32 %v514_v23, 0.0  ;;  %v716_v28 = vmax.f32 %v642_v24, 0.0  ;;  %v525_v29 = vadd.f32 %v928_v25, %v1164_v36  ;;  %v653_v30 = vadd.f32 %v960_v26, %v1164_v36 }
 0x10c   :  { %v516_v31 = vpop.f32.mrf.mxu0  ;;  %v644_v32 = vpop.f32.mrf.mxu1 }
 0x10d   :  { %748 = vst [vmem:[%s1425_s3 + $0xe0] sm:$0xff] %v684_v27  ;;  %780 = vst [vmem:[%s1425_s3 + $0x1e0] sm:$0xff] %v716_v28  ;;  %v687_v33 = vmax.f32 %v525_v29, 0.0  ;;  %v719_v34 = vmax.f32 %v653_v30, 0.0  ;;  %v517_v35 = vadd.f32 %v1164_v36, %v516_v31  ;;  %v645_v37 = vadd.f32 %v1164_v36, %v644_v32 }
 0x10f   :  { %751 = vst [vmem:[%s1425_s3 + $0xf8] sm:$0xff] %v687_v33  ;;  %783 = vst [vmem:[%s1425_s3 + $0x1f8] sm:$0xff] %v719_v34  ;;  %v685_v38 = vmax.f32 %v517_v35, 0.0  ;;  %v717_v39 = vmax.f32 %v645_v37, 0.0 }
 0x111   :  { %749 = vst [vmem:[%s1425_s3 + $0xe8] sm:$0xff] %v685_v38  ;;  %781 = vst [vmem:[%s1425_s3 + $0x1e8] sm:$0xff] %v717_v39 }

// kernel: _lambda_.9
= control target key start
LH: loop header
LB: loop body
LE: loop exit
PB: predicated region body
PF: predicated region fallthrough
CT: control target
= control target key end

     0   :  { %vm379_vm0 = vcmask 1043456   ;;  %vm282_vm1 = vcmask 588800   ;;  %s1458_s1 = inlined_call_operand.vmem [shape: bf16[72,128], index: 1, kind: input, shape index: {}]   ;;  %s1459_s0 = inlined_call_operand.vmem [shape: bf16[512,72], index: 0, kind: input, shape index: {}]   ;;  %s1460_s2 = inlined_call_operand.vmem [shape: f32[1,128], index: 2, kind: input, shape index: {}]   ;;  %s1461_s3 = inlined_call_operand.vmem [shape: f32[512,128], index: 3, kind: output, shape index: {}]  }
   0x1   :  { %v997_v0 = vld [vmem:[%s1458_s1 + $0x20] ss:$0 sps:$4 sm:$0xff]   ;;  %v998_v1 = vld [vmem:[%s1458_s1 + $0x18] sm:$0xff]   ;;  %v999_v3 = vld [vmem:[%s1458_s1 + $0x10] sm:$0xff]  }
   0x2   :  { %995 = vmatprep.subr.msk.bf16.mxu0 %vm379_vm0, %v997_v0  ;;  %996 = vmatprep.subr.msk.bf16.mxu1 %vm379_vm0, %v997_v0  ;;  %v381_v2 = vsel %vm379_vm0, %v997_v0, 0  ;;  %v1002_v4 = vld [vmem:[%s1459_s0] sm:$0xff]   ;;  %v1000_v6 = vld [vmem:[%s1458_s1 + $0x8] sm:$0xff]   ;;  %v1006_v10 = vld [vmem:[%s1459_s0 + $0x10] sm:$0xff]  }
   0x3   :  { %912 = vmatpush3.bf16.msra.mxu0 %v381_v2  ;;  %990 = vmatpush3.bf16.msra.mxu1 %v381_v2  ;;  %v1003_v5 = vld [vmem:[%s1459_s0 + $0x80] sm:$0xff]   ;;  %v1004_v8 = vld [vmem:[%s1459_s0 + $0x8] sm:$0xff]   ;;  %v1007_v11 = vld [vmem:[%s1459_s0 + $0x90] sm:$0xff]  }
   0x4   :  { %913 = vmatprep.subr.bf16.mxu0 %v998_v1  ;;  %986 = vmatprep.subr.bf16.mxu1 %v998_v1  ;;  %v1001_v7 = vld [vmem:[%s1458_s1] sm:$0xff]   ;;  %v1005_v9 = vld [vmem:[%s1459_s0 + $0x88] sm:$0xff]   ;;  %v1008_v12 = vld [vmem:[%s1459_s0 + $0x18] sm:$0xff]  }
   0x5   :  { %921 = vmatprep.mubr.msk.bf16.mxu0 %vm282_vm1, %v1002_v4  ;;  %953 = vmatprep.mubr.msk.bf16.mxu1 %vm282_vm1, %v1003_v5  ;;  %v1009_v13 = vld [vmem:[%s1459_s0 + $0x98] sm:$0xff]   ;;  %v1010_v14 = vld [vmem:[%s1459_s0 + $0x20] sm:$0xff]   ;;  %v1012_v16 = vld [vmem:[%s1459_s0 + $0x28] sm:$0xff]  }
   0x6   :  { %v1011_v15 = vld [vmem:[%s1459_s0 + $0xa0] sm:$0xff]   ;;  %v1013_v17 = vld [vmem:[%s1459_s0 + $0xa8] sm:$0xff]   ;;  %v1014_v18 = vld [vmem:[%s1459_s0 + $0x30] sm:$0xff]  }
   0x7   :  { %914 = vmatpush3.bf16.msra.mxu0 %v998_v1  ;;  %991 = vmatpush3.bf16.msra.mxu1 %v998_v1  ;;  %v1015_v19 = vld [vmem:[%s1459_s0 + $0xb0] sm:$0xff]   ;;  %v1016_v20 = vld [vmem:[%s1459_s0 + $0x38] sm:$0xff]   ;;  %v1018_v22 = vld [vmem:[%s1459_s0 + $0x40] sm:$0xff]  }
   0x8   :  { %915 = vmatprep.subr.bf16.mxu0 %v999_v3  ;;  %987 = vmatprep.subr.bf16.mxu1 %v999_v3  ;;  %v1017_v21 = vld [vmem:[%s1459_s0 + $0xb8] sm:$0xff]   ;;  %v1019_v23 = vld [vmem:[%s1459_s0 + $0xc0] sm:$0xff]   ;;  %v1020_v24 = vld [vmem:[%s1459_s0 + $0x48] sm:$0xff]  }
   0x9   :  { %v1021_v25 = vld [vmem:[%s1459_s0 + $0xc8] sm:$0xff]   ;;  %v1022_v26 = vld [vmem:[%s1459_s0 + $0x50] sm:$0xff]   ;;  %v1024_v28 = vld [vmem:[%s1459_s0 + $0x58] sm:$0xff]  }
   0xa   :  { %v1023_v27 = vld [vmem:[%s1459_s0 + $0xd0] sm:$0xff]   ;;  %v1025_v29 = vld [vmem:[%s1459_s0 + $0xd8] sm:$0xff]   ;;  %v1026_v30 = vld [vmem:[%s1459_s0 + $0x60] sm:$0xff]  }
   0xb   :  { %916 = vmatpush3.bf16.msra.mxu0 %v999_v3  ;;  %992 = vmatpush3.bf16.msra.mxu1 %v999_v3  ;;  %v1027_v31 = vld [vmem:[%s1459_s0 + $0xe0] sm:$0xff]   ;;  %v1028_v32 = vld [vmem:[%s1459_s0 + $0x68] sm:$0xff]   ;;  %v1030_v34 = vld [vmem:[%s1459_s0 + $0x70] sm:$0xff]  }
   0xc   :  { %917 = vmatprep.subr.bf16.mxu0 %v1000_v6  ;;  %988 = vmatprep.subr.bf16.mxu1 %v1000_v6  ;;  %v1029_v33 = vld [vmem:[%s1459_s0 + $0xe8] sm:$0xff]   ;;  %v1031_v35 = vld [vmem:[%s1459_s0 + $0xf0] sm:$0xff]   ;;  %v1032_v36 = vld [vmem:[%s1459_s0 + $0x78] sm:$0xff]  }
   0xd   :  { %v1033_v37 = vld [vmem:[%s1459_s0 + $0xf8] sm:$0xff]   ;;  %v1200_v38 = vld [vmem:[%s1460_s2] ss:$0 sm:$0xff] }
   0xf   :  { %918 = vmatpush3.bf16.msra.mxu0 %v1000_v6  ;;  %993 = vmatpush3.bf16.msra.mxu1 %v1000_v6 }
  0x10   :  { %919 = vmatprep.subr.bf16.mxu0 %v1001_v7  ;;  %989 = vmatprep.subr.bf16.mxu1 %v1001_v7 }
  0x13   :  { %920 = vmatpush3.bf16.msra.mxu0 %v1001_v7  ;;  %994 = vmatpush3.bf16.msra.mxu1 %v1001_v7 }
  0x16   :  { %922 = vmatmul.mubr.msk.bf16.vlgmr.msra.gmra.mxu0 %vm282_vm1, %v1004_v8  ;;  %954 = vmatmul.mubr.msk.bf16.vlgmr.msra.gmra.mxu1 %vm282_vm1, %v1005_v9 }
  0x17   :  { %925 = vmatprep.mubr.msk.bf16.mxu0 %vm282_vm1, %v1006_v10  ;;  %957 = vmatprep.mubr.msk.bf16.mxu1 %vm282_vm1, %v1007_v11 }
  0x1e   :  { %926 = vmatmul.mubr.msk.bf16.gmra.mxu0 %vm282_vm1, %v1008_v12  ;;  %958 = vmatmul.mubr.msk.bf16.gmra.mxu1 %vm282_vm1, %v1009_v13 }
  0x1f   :  { %929 = vmatprep.mubr.msk.bf16.mxu0 %vm282_vm1, %v1010_v14  ;;  %961 = vmatprep.mubr.msk.bf16.mxu1 %vm282_vm1, %v1011_v15 }
  0x26   :  { %930 = vmatmul.mubr.msk.bf16.gmra.mxu0 %vm282_vm1, %v1012_v16  ;;  %962 = vmatmul.mubr.msk.bf16.gmra.mxu1 %vm282_vm1, %v1013_v17 }
  0x27   :  { %933 = vmatprep.mubr.msk.bf16.mxu0 %vm282_vm1, %v1014_v18  ;;  %965 = vmatprep.mubr.msk.bf16.mxu1 %vm282_vm1, %v1015_v19 }
  0x2e   :  { %934 = vmatmul.mubr.msk.bf16.gmra.mxu0 %vm282_vm1, %v1016_v20  ;;  %966 = vmatmul.mubr.msk.bf16.gmra.mxu1 %vm282_vm1, %v1017_v21 }
  0x2f   :  { %937 = vmatprep.mubr.msk.bf16.mxu0 %vm282_vm1, %v1018_v22  ;;  %969 = vmatprep.mubr.msk.bf16.mxu1 %vm282_vm1, %v1019_v23 }
  0x36   :  { %938 = vmatmul.mubr.msk.bf16.gmra.mxu0 %vm282_vm1, %v1020_v24  ;;  %970 = vmatmul.mubr.msk.bf16.gmra.mxu1 %vm282_vm1, %v1021_v25 }
  0x37   :  { %941 = vmatprep.mubr.msk.bf16.mxu0 %vm282_vm1, %v1022_v26  ;;  %973 = vmatprep.mubr.msk.bf16.mxu1 %vm282_vm1, %v1023_v27 }
  0x3e   :  { %942 = vmatmul.mubr.msk.bf16.gmra.mxu0 %vm282_vm1, %v1024_v28  ;;  %974 = vmatmul.mubr.msk.bf16.gmra.mxu1 %vm282_vm1, %v1025_v29 }
  0x3f   :  { %945 = vmatprep.mubr.msk.bf16.mxu0 %vm282_vm1, %v1026_v30  ;;  %977 = vmatprep.mubr.msk.bf16.mxu1 %vm282_vm1, %v1027_v31 }
  0x46   :  { %946 = vmatmul.mubr.msk.bf16.gmra.mxu0 %vm282_vm1, %v1028_v32  ;;  %978 = vmatmul.mubr.msk.bf16.gmra.mxu1 %vm282_vm1, %v1029_v33 }
  0x47   :  { %949 = vmatprep.mubr.msk.bf16.mxu0 %vm282_vm1, %v1030_v34  ;;  %981 = vmatprep.mubr.msk.bf16.mxu1 %vm282_vm1, %v1031_v35 }
  0x4e   :  { %950 = vmatmul.mubr.msk.bf16.gmra.mxu0 %vm282_vm1, %v1032_v36  ;;  %982 = vmatmul.mubr.msk.bf16.gmra.mxu1 %vm282_vm1, %v1033_v37 }
  0xd6   :  { %v923_v39 = vpop.f32.mrf.mxu0  ;;  %v955_v40 = vpop.f32.mrf.mxu1 }
  0xd7   :  { %v426_v41 = vadd.f32 %v923_v39, %v1200_v38  ;;  %v554_v42 = vadd.f32 %v955_v40, %v1200_v38 }
  0xd8   :  { %v417_v43 = vpop.f32.mrf.mxu0  ;;  %v545_v44 = vpop.f32.mrf.mxu1 }
  0xd9   :  { %v674_v45 = vmax.f32 %v426_v41, 0.0  ;;  %v706_v46 = vmax.f32 %v554_v42, 0.0  ;;  %v418_v47 = vadd.f32 %v1200_v38, %v417_v43  ;;  %v546_v48 = vadd.f32 %v1200_v38, %v545_v44 }
  0xda   :  { %v924_v49 = vpop.f32.mrf.mxu0  ;;  %v956_v50 = vpop.f32.mrf.mxu1 }
  0xdb   :  { %738 = vst [vmem:[%s1461_s3 + $0x10] sm:$0xff] %v674_v45  ;;  %770 = vst [vmem:[%s1461_s3 + $0x110] sm:$0xff] %v706_v46  ;;  %v672_v51 = vmax.f32 %v418_v47, 0.0  ;;  %v704_v52 = vmax.f32 %v546_v48, 0.0  ;;  %v429_v53 = vadd.f32 %v924_v49, %v1200_v38  ;;  %v557_v54 = vadd.f32 %v956_v50, %v1200_v38 }
  0xdc   :  { %v420_v55 = vpop.f32.mrf.mxu0  ;;  %v548_v56 = vpop.f32.mrf.mxu1 }
  0xdd   :  { %736 = vst [vmem:[%s1461_s3] sm:$0xff] %v672_v51  ;;  %768 = vst [vmem:[%s1461_s3 + $0x100] sm:$0xff] %v704_v52  ;;  %v675_v57 = vmax.f32 %v429_v53, 0.0  ;;  %v707_v58 = vmax.f32 %v557_v54, 0.0  ;;  %v421_v59 = vadd.f32 %v1200_v38, %v420_v55  ;;  %v549_v60 = vadd.f32 %v1200_v38, %v548_v56 }
  0xde   :  { %v927_v61 = vpop.f32.mrf.mxu0  ;;  %v959_v62 = vpop.f32.mrf.mxu1 }
  0xdf   :  { %739 = vst [vmem:[%s1461_s3 + $0x18] sm:$0xff] %v675_v57  ;;  %771 = vst [vmem:[%s1461_s3 + $0x118] sm:$0xff] %v707_v58  ;;  %v673_v63 = vmax.f32 %v421_v59, 0.0  ;;  %v705_v0 = vmax.f32 %v549_v60, 0.0  ;;  %v442_v1 = vadd.f32 %v927_v61, %v1200_v38  ;;  %v570_v2 = vadd.f32 %v959_v62, %v1200_v38 }
  0xe0   :  { %v433_v3 = vpop.f32.mrf.mxu0  ;;  %v561_v4 = vpop.f32.mrf.mxu1 }
  0xe1   :  { %737 = vst [vmem:[%s1461_s3 + $0x8] sm:$0xff] %v673_v63  ;;  %769 = vst [vmem:[%s1461_s3 + $0x108] sm:$0xff] %v705_v0  ;;  %v678_v5 = vmax.f32 %v442_v1, 0.0  ;;  %v710_v6 = vmax.f32 %v570_v2, 0.0  ;;  %v434_v7 = vadd.f32 %v1200_v38, %v433_v3  ;;  %v562_v8 = vadd.f32 %v1200_v38, %v561_v4 }
  0xe2   :  { %v928_v9 = vpop.f32.mrf.mxu0  ;;  %v960_v10 = vpop.f32.mrf.mxu1 }
  0xe3   :  { %742 = vst [vmem:[%s1461_s3 + $0x30] sm:$0xff] %v678_v5  ;;  %774 = vst [vmem:[%s1461_s3 + $0x130] sm:$0xff] %v710_v6  ;;  %v676_v11 = vmax.f32 %v434_v7, 0.0  ;;  %v708_v12 = vmax.f32 %v562_v8, 0.0  ;;  %v445_v13 = vadd.f32 %v928_v9, %v1200_v38  ;;  %v573_v14 = vadd.f32 %v960_v10, %v1200_v38 }
  0xe4   :  { %v436_v15 = vpop.f32.mrf.mxu0  ;;  %v564_v16 = vpop.f32.mrf.mxu1 }
  0xe5   :  { %740 = vst [vmem:[%s1461_s3 + $0x20] sm:$0xff] %v676_v11  ;;  %772 = vst [vmem:[%s1461_s3 + $0x120] sm:$0xff] %v708_v12  ;;  %v679_v17 = vmax.f32 %v445_v13, 0.0  ;;  %v711_v18 = vmax.f32 %v573_v14, 0.0  ;;  %v437_v19 = vadd.f32 %v1200_v38, %v436_v15  ;;  %v565_v20 = vadd.f32 %v1200_v38, %v564_v16 }
  0xe6   :  { %v931_v21 = vpop.f32.mrf.mxu0  ;;  %v963_v22 = vpop.f32.mrf.mxu1 }
  0xe7   :  { %743 = vst [vmem:[%s1461_s3 + $0x38] sm:$0xff] %v679_v17  ;;  %775 = vst [vmem:[%s1461_s3 + $0x138] sm:$0xff] %v711_v18  ;;  %v677_v23 = vmax.f32 %v437_v19, 0.0  ;;  %v709_v24 = vmax.f32 %v565_v20, 0.0  ;;  %v458_v25 = vadd.f32 %v931_v21, %v1200_v38  ;;  %v586_v26 = vadd.f32 %v963_v22, %v1200_v38 }
  0xe8   :  { %v449_v27 = vpop.f32.mrf.mxu0  ;;  %v577_v28 = vpop.f32.mrf.mxu1 }
  0xe9   :  { %741 = vst [vmem:[%s1461_s3 + $0x28] sm:$0xff] %v677_v23  ;;  %773 = vst [vmem:[%s1461_s3 + $0x128] sm:$0xff] %v709_v24  ;;  %v682_v29 = vmax.f32 %v458_v25, 0.0  ;;  %v714_v30 = vmax.f32 %v586_v26, 0.0  ;;  %v450_v31 = vadd.f32 %v1200_v38, %v449_v27  ;;  %v578_v32 = vadd.f32 %v1200_v38, %v577_v28 }
  0xea   :  { %v932_v33 = vpop.f32.mrf.mxu0  ;;  %v964_v34 = vpop.f32.mrf.mxu1 }
  0xeb   :  { %746 = vst [vmem:[%s1461_s3 + $0x50] sm:$0xff] %v682_v29  ;;  %778 = vst [vmem:[%s1461_s3 + $0x150] sm:$0xff] %v714_v30  ;;  %v680_v35 = vmax.f32 %v450_v31, 0.0  ;;  %v712_v36 = vmax.f32 %v578_v32, 0.0  ;;  %v461_v37 = vadd.f32 %v932_v33, %v1200_v38  ;;  %v589_v39 = vadd.f32 %v964_v34, %v1200_v38 }
  0xec   :  { %v452_v40 = vpop.f32.mrf.mxu0  ;;  %v580_v41 = vpop.f32.mrf.mxu1 }
  0xed   :  { %744 = vst [vmem:[%s1461_s3 + $0x40] sm:$0xff] %v680_v35  ;;  %776 = vst [vmem:[%s1461_s3 + $0x140] sm:$0xff] %v712_v36  ;;  %v683_v42 = vmax.f32 %v461_v37, 0.0  ;;  %v715_v43 = vmax.f32 %v589_v39, 0.0  ;;  %v453_v44 = vadd.f32 %v1200_v38, %v452_v40  ;;  %v581_v45 = vadd.f32 %v1200_v38, %v580_v41 }
  0xee   :  { %v935_v46 = vpop.f32.mrf.mxu0  ;;  %v967_v47 = vpop.f32.mrf.mxu1 }
  0xef   :  { %747 = vst [vmem:[%s1461_s3 + $0x58] sm:$0xff] %v683_v42  ;;  %779 = vst [vmem:[%s1461_s3 + $0x158] sm:$0xff] %v715_v43  ;;  %v681_v48 = vmax.f32 %v453_v44, 0.0  ;;  %v713_v49 = vmax.f32 %v581_v45, 0.0  ;;  %v474_v50 = vadd.f32 %v935_v46, %v1200_v38  ;;  %v602_v51 = vadd.f32 %v967_v47, %v1200_v38 }
  0xf0   :  { %v465_v52 = vpop.f32.mrf.mxu0  ;;  %v593_v53 = vpop.f32.mrf.mxu1 }
  0xf1   :  { %745 = vst [vmem:[%s1461_s3 + $0x48] sm:$0xff] %v681_v48  ;;  %777 = vst [vmem:[%s1461_s3 + $0x148] sm:$0xff] %v713_v49  ;;  %v686_v54 = vmax.f32 %v474_v50, 0.0  ;;  %v718_v55 = vmax.f32 %v602_v51, 0.0  ;;  %v466_v56 = vadd.f32 %v1200_v38, %v465_v52  ;;  %v594_v57 = vadd.f32 %v1200_v38, %v593_v53 }
  0xf2   :  { %v936_v58 = vpop.f32.mrf.mxu0  ;;  %v968_v59 = vpop.f32.mrf.mxu1 }
  0xf3   :  { %750 = vst [vmem:[%s1461_s3 + $0x70] sm:$0xff] %v686_v54  ;;  %782 = vst [vmem:[%s1461_s3 + $0x170] sm:$0xff] %v718_v55  ;;  %v684_v60 = vmax.f32 %v466_v56, 0.0  ;;  %v716_v61 = vmax.f32 %v594_v57, 0.0  ;;  %v477_v62 = vadd.f32 %v936_v58, %v1200_v38  ;;  %v605_v63 = vadd.f32 %v968_v59, %v1200_v38 }
  0xf4   :  { %v468_v0 = vpop.f32.mrf.mxu0  ;;  %v596_v1 = vpop.f32.mrf.mxu1 }
  0xf5   :  { %748 = vst [vmem:[%s1461_s3 + $0x60] sm:$0xff] %v684_v60  ;;  %780 = vst [vmem:[%s1461_s3 + $0x160] sm:$0xff] %v716_v61  ;;  %v687_v2 = vmax.f32 %v477_v62, 0.0  ;;  %v719_v3 = vmax.f32 %v605_v63, 0.0  ;;  %v469_v4 = vadd.f32 %v1200_v38, %v468_v0  ;;  %v597_v5 = vadd.f32 %v1200_v38, %v596_v1 }
  0xf6   :  { %v939_v6 = vpop.f32.mrf.mxu0  ;;  %v971_v7 = vpop.f32.mrf.mxu1 }
  0xf7   :  { %751 = vst [vmem:[%s1461_s3 + $0x78] sm:$0xff] %v687_v2  ;;  %783 = vst [vmem:[%s1461_s3 + $0x178] sm:$0xff] %v719_v3  ;;  %v685_v8 = vmax.f32 %v469_v4, 0.0  ;;  %v717_v9 = vmax.f32 %v597_v5, 0.0  ;;  %v490_v10 = vadd.f32 %v939_v6, %v1200_v38  ;;  %v618_v11 = vadd.f32 %v971_v7, %v1200_v38 }
  0xf8   :  { %v481_v12 = vpop.f32.mrf.mxu0  ;;  %v609_v13 = vpop.f32.mrf.mxu1 }
  0xf9   :  { %749 = vst [vmem:[%s1461_s3 + $0x68] sm:$0xff] %v685_v8  ;;  %781 = vst [vmem:[%s1461_s3 + $0x168] sm:$0xff] %v717_v9  ;;  %v690_v14 = vmax.f32 %v490_v10, 0.0  ;;  %v722_v15 = vmax.f32 %v618_v11, 0.0  ;;  %v482_v16 = vadd.f32 %v1200_v38, %v481_v12  ;;  %v610_v17 = vadd.f32 %v1200_v38, %v609_v13 }
  0xfa   :  { %v940_v18 = vpop.f32.mrf.mxu0  ;;  %v972_v19 = vpop.f32.mrf.mxu1 }
  0xfb   :  { %754 = vst [vmem:[%s1461_s3 + $0x90] sm:$0xff] %v690_v14  ;;  %786 = vst [vmem:[%s1461_s3 + $0x190] sm:$0xff] %v722_v15  ;;  %v688_v20 = vmax.f32 %v482_v16, 0.0  ;;  %v720_v21 = vmax.f32 %v610_v17, 0.0  ;;  %v493_v22 = vadd.f32 %v940_v18, %v1200_v38  ;;  %v621_v23 = vadd.f32 %v972_v19, %v1200_v38 }
  0xfc   :  { %v484_v24 = vpop.f32.mrf.mxu0  ;;  %v612_v25 = vpop.f32.mrf.mxu1 }
  0xfd   :  { %752 = vst [vmem:[%s1461_s3 + $0x80] sm:$0xff] %v688_v20  ;;  %784 = vst [vmem:[%s1461_s3 + $0x180] sm:$0xff] %v720_v21  ;;  %v691_v26 = vmax.f32 %v493_v22, 0.0  ;;  %v723_v27 = vmax.f32 %v621_v23, 0.0  ;;  %v485_v28 = vadd.f32 %v1200_v38, %v484_v24  ;;  %v613_v29 = vadd.f32 %v1200_v38, %v612_v25 }
  0xfe   :  { %v943_v30 = vpop.f32.mrf.mxu0  ;;  %v975_v31 = vpop.f32.mrf.mxu1 }
  0xff   :  { %755 = vst [vmem:[%s1461_s3 + $0x98] sm:$0xff] %v691_v26  ;;  %787 = vst [vmem:[%s1461_s3 + $0x198] sm:$0xff] %v723_v27  ;;  %v689_v32 = vmax.f32 %v485_v28, 0.0  ;;  %v721_v33 = vmax.f32 %v613_v29, 0.0  ;;  %v506_v34 = vadd.f32 %v943_v30, %v1200_v38  ;;  %v634_v35 = vadd.f32 %v975_v31, %v1200_v38 }
 0x100   :  { %v497_v36 = vpop.f32.mrf.mxu0  ;;  %v625_v37 = vpop.f32.mrf.mxu1 }
 0x101   :  { %753 = vst [vmem:[%s1461_s3 + $0x88] sm:$0xff] %v689_v32  ;;  %785 = vst [vmem:[%s1461_s3 + $0x188] sm:$0xff] %v721_v33  ;;  %v694_v39 = vmax.f32 %v506_v34, 0.0  ;;  %v726_v40 = vmax.f32 %v634_v35, 0.0  ;;  %v498_v41 = vadd.f32 %v1200_v38, %v497_v36  ;;  %v626_v42 = vadd.f32 %v1200_v38, %v625_v37 }
 0x102   :  { %v944_v43 = vpop.f32.mrf.mxu0  ;;  %v976_v44 = vpop.f32.mrf.mxu1 }
 0x103   :  { %758 = vst [vmem:[%s1461_s3 + $0xb0] sm:$0xff] %v694_v39  ;;  %790 = vst [vmem:[%s1461_s3 + $0x1b0] sm:$0xff] %v726_v40  ;;  %v692_v45 = vmax.f32 %v498_v41, 0.0  ;;  %v724_v46 = vmax.f32 %v626_v42, 0.0  ;;  %v509_v47 = vadd.f32 %v944_v43, %v1200_v38  ;;  %v637_v48 = vadd.f32 %v976_v44, %v1200_v38 }
 0x104   :  { %v500_v49 = vpop.f32.mrf.mxu0  ;;  %v628_v50 = vpop.f32.mrf.mxu1 }
 0x105   :  { %756 = vst [vmem:[%s1461_s3 + $0xa0] sm:$0xff] %v692_v45  ;;  %788 = vst [vmem:[%s1461_s3 + $0x1a0] sm:$0xff] %v724_v46  ;;  %v695_v51 = vmax.f32 %v509_v47, 0.0  ;;  %v727_v52 = vmax.f32 %v637_v48, 0.0  ;;  %v501_v53 = vadd.f32 %v1200_v38, %v500_v49  ;;  %v629_v54 = vadd.f32 %v1200_v38, %v628_v50 }
 0x106   :  { %v947_v55 = vpop.f32.mrf.mxu0  ;;  %v979_v56 = vpop.f32.mrf.mxu1 }
 0x107   :  { %759 = vst [vmem:[%s1461_s3 + $0xb8] sm:$0xff] %v695_v51  ;;  %791 = vst [vmem:[%s1461_s3 + $0x1b8] sm:$0xff] %v727_v52  ;;  %v693_v57 = vmax.f32 %v501_v53, 0.0  ;;  %v725_v58 = vmax.f32 %v629_v54, 0.0  ;;  %v522_v59 = vadd.f32 %v947_v55, %v1200_v38  ;;  %v650_v60 = vadd.f32 %v979_v56, %v1200_v38 }
 0x108   :  { %v513_v61 = vpop.f32.mrf.mxu0  ;;  %v641_v62 = vpop.f32.mrf.mxu1 }
 0x109   :  { %757 = vst [vmem:[%s1461_s3 + $0xa8] sm:$0xff] %v693_v57  ;;  %789 = vst [vmem:[%s1461_s3 + $0x1a8] sm:$0xff] %v725_v58  ;;  %v698_v63 = vmax.f32 %v522_v59, 0.0  ;;  %v730_v0 = vmax.f32 %v650_v60, 0.0  ;;  %v514_v1 = vadd.f32 %v1200_v38, %v513_v61  ;;  %v642_v2 = vadd.f32 %v1200_v38, %v641_v62 }
 0x10a   :  { %v948_v3 = vpop.f32.mrf.mxu0  ;;  %v980_v4 = vpop.f32.mrf.mxu1 }
 0x10b   :  { %762 = vst [vmem:[%s1461_s3 + $0xd0] sm:$0xff] %v698_v63  ;;  %794 = vst [vmem:[%s1461_s3 + $0x1d0] sm:$0xff] %v730_v0  ;;  %v696_v5 = vmax.f32 %v514_v1, 0.0  ;;  %v728_v6 = vmax.f32 %v642_v2, 0.0  ;;  %v525_v7 = vadd.f32 %v948_v3, %v1200_v38  ;;  %v653_v8 = vadd.f32 %v980_v4, %v1200_v38 }
 0x10c   :  { %v516_v9 = vpop.f32.mrf.mxu0  ;;  %v644_v10 = vpop.f32.mrf.mxu1 }
 0x10d   :  { %760 = vst [vmem:[%s1461_s3 + $0xc0] sm:$0xff] %v696_v5  ;;  %792 = vst [vmem:[%s1461_s3 + $0x1c0] sm:$0xff] %v728_v6  ;;  %v699_v11 = vmax.f32 %v525_v7, 0.0  ;;  %v731_v12 = vmax.f32 %v653_v8, 0.0  ;;  %v517_v13 = vadd.f32 %v1200_v38, %v516_v9  ;;  %v645_v14 = vadd.f32 %v1200_v38, %v644_v10 }
 0x10e   :  { %v951_v15 = vpop.f32.mrf.mxu0  ;;  %v983_v16 = vpop.f32.mrf.mxu1 }
 0x10f   :  { %763 = vst [vmem:[%s1461_s3 + $0xd8] sm:$0xff] %v699_v11  ;;  %795 = vst [vmem:[%s1461_s3 + $0x1d8] sm:$0xff] %v731_v12  ;;  %v697_v17 = vmax.f32 %v517_v13, 0.0  ;;  %v729_v18 = vmax.f32 %v645_v14, 0.0  ;;  %v538_v19 = vadd.f32 %v951_v15, %v1200_v38  ;;  %v666_v20 = vadd.f32 %v983_v16, %v1200_v38 }
 0x110   :  { %v529_v21 = vpop.f32.mrf.mxu0  ;;  %v657_v22 = vpop.f32.mrf.mxu1 }
 0x111   :  { %761 = vst [vmem:[%s1461_s3 + $0xc8] sm:$0xff] %v697_v17  ;;  %793 = vst [vmem:[%s1461_s3 + $0x1c8] sm:$0xff] %v729_v18  ;;  %v702_v23 = vmax.f32 %v538_v19, 0.0  ;;  %v734_v24 = vmax.f32 %v666_v20, 0.0  ;;  %v530_v25 = vadd.f32 %v1200_v38, %v529_v21  ;;  %v658_v26 = vadd.f32 %v1200_v38, %v657_v22 }
 0x112   :  { %v952_v27 = vpop.f32.mrf.mxu0  ;;  %v984_v28 = vpop.f32.mrf.mxu1 }
 0x113   :  { %766 = vst [vmem:[%s1461_s3 + $0xf0] sm:$0xff] %v702_v23  ;;  %798 = vst [vmem:[%s1461_s3 + $0x1f0] sm:$0xff] %v734_v24  ;;  %v700_v29 = vmax.f32 %v530_v25, 0.0  ;;  %v732_v30 = vmax.f32 %v658_v26, 0.0  ;;  %v541_v31 = vadd.f32 %v952_v27, %v1200_v38  ;;  %v669_v32 = vadd.f32 %v984_v28, %v1200_v38 }
 0x114   :  { %v532_v33 = vpop.f32.mrf.mxu0  ;;  %v660_v34 = vpop.f32.mrf.mxu1 }
 0x115   :  { %764 = vst [vmem:[%s1461_s3 + $0xe0] sm:$0xff] %v700_v29  ;;  %796 = vst [vmem:[%s1461_s3 + $0x1e0] sm:$0xff] %v732_v30  ;;  %v703_v35 = vmax.f32 %v541_v31, 0.0  ;;  %v735_v36 = vmax.f32 %v669_v32, 0.0  ;;  %v533_v37 = vadd.f32 %v1200_v38, %v532_v33  ;;  %v661_v39 = vadd.f32 %v1200_v38, %v660_v34 }
 0x117   :  { %767 = vst [vmem:[%s1461_s3 + $0xf8] sm:$0xff] %v703_v35  ;;  %799 = vst [vmem:[%s1461_s3 + $0x1f8] sm:$0xff] %v735_v36  ;;  %v701_v40 = vmax.f32 %v533_v37, 0.0  ;;  %v733_v41 = vmax.f32 %v661_v39, 0.0 }
 0x119   :  { %765 = vst [vmem:[%s1461_s3 + $0xe8] sm:$0xff] %v701_v40  ;;  %797 = vst [vmem:[%s1461_s3 + $0x1e8] sm:$0xff] %v733_v41 }

// kernel: _lambda_.10
= control target key start
LH: loop header
LB: loop body
LE: loop exit
PB: predicated region body
PF: predicated region fallthrough
CT: control target
= control target key end

     0   :  { %vm139_vm0 = vcmask 1043456   ;;  %vm114_vm1 = vcmask 588800   ;;  %s480_s1 = inlined_call_operand.vmem [shape: bf16[72,128], index: 1, kind: input, shape index: {}]   ;;  %s481_s0 = inlined_call_operand.vmem [shape: bf16[128,72], index: 0, kind: input, shape index: {}]   ;;  %s482_s2 = inlined_call_operand.vmem [shape: f32[1,128], index: 2, kind: input, shape index: {}]   ;;  %s483_s3 = inlined_call_operand.vmem [shape: f32[128,128], index: 3, kind: output, shape index: {}]  }
   0x1   :  { %v349_v0 = vld [vmem:[%s480_s1 + $0x20] ss:$0 sps:$4 sm:$0xff]   ;;  %v350_v1 = vld [vmem:[%s480_s1 + $0x18] sm:$0xff]   ;;  %v351_v3 = vld [vmem:[%s480_s1 + $0x10] sm:$0xff]  }
   0x2   :  { %347 = vmatprep.subr.msk.bf16.mxu0 %vm139_vm0, %v349_v0  ;;  %348 = vmatprep.subr.msk.bf16.mxu1 %vm139_vm0, %v349_v0  ;;  %v141_v2 = vsel %vm139_vm0, %v349_v0, 0  ;;  %v354_v4 = vld [vmem:[%s481_s0] sm:$0xff]   ;;  %v352_v6 = vld [vmem:[%s480_s1 + $0x8] sm:$0xff]   ;;  %v358_v10 = vld [vmem:[%s481_s0 + $0x10] sm:$0xff]  }
   0x3   :  { %312 = vmatpush3.bf16.msra.mxu0 %v141_v2  ;;  %342 = vmatpush3.bf16.msra.mxu1 %v141_v2  ;;  %v355_v5 = vld [vmem:[%s481_s0 + $0x20] sm:$0xff]   ;;  %v356_v8 = vld [vmem:[%s481_s0 + $0x8] sm:$0xff]   ;;  %v359_v11 = vld [vmem:[%s481_s0 + $0x30] sm:$0xff]  }
   0x4   :  { %313 = vmatprep.subr.bf16.mxu0 %v350_v1  ;;  %338 = vmatprep.subr.bf16.mxu1 %v350_v1  ;;  %v353_v7 = vld [vmem:[%s480_s1] sm:$0xff]   ;;  %v357_v9 = vld [vmem:[%s481_s0 + $0x28] sm:$0xff]   ;;  %v360_v12 = vld [vmem:[%s481_s0 + $0x18] sm:$0xff]  }
   0x5   :  { %321 = vmatprep.mubr.msk.bf16.mxu0 %vm114_vm1, %v354_v4  ;;  %329 = vmatprep.mubr.msk.bf16.mxu1 %vm114_vm1, %v355_v5  ;;  %v361_v13 = vld [vmem:[%s481_s0 + $0x38] sm:$0xff]   ;;  %v276_v14 = vld [vmem:[%s482_s2] ss:$0 sm:$0xff] }
   0x7   :  { %314 = vmatpush3.bf16.msra.mxu0 %v350_v1  ;;  %343 = vmatpush3.bf16.msra.mxu1 %v350_v1 }
   0x8   :  { %315 = vmatprep.subr.bf16.mxu0 %v351_v3  ;;  %339 = vmatprep.subr.bf16.mxu1 %v351_v3 }
   0xb   :  { %316 = vmatpush3.bf16.msra.mxu0 %v351_v3  ;;  %344 = vmatpush3.bf16.msra.mxu1 %v351_v3 }
   0xc   :  { %317 = vmatprep.subr.bf16.mxu0 %v352_v6  ;;  %340 = vmatprep.subr.bf16.mxu1 %v352_v6 }
   0xf   :  { %318 = vmatpush3.bf16.msra.mxu0 %v352_v6  ;;  %345 = vmatpush3.bf16.msra.mxu1 %v352_v6 }
  0x10   :  { %319 = vmatprep.subr.bf16.mxu0 %v353_v7  ;;  %341 = vmatprep.subr.bf16.mxu1 %v353_v7 }
  0x13   :  { %320 = vmatpush3.bf16.msra.mxu0 %v353_v7  ;;  %346 = vmatpush3.bf16.msra.mxu1 %v353_v7 }
  0x16   :  { %322 = vmatmul.mubr.msk.bf16.vlgmr.msra.gmra.mxu0 %vm114_vm1, %v356_v8  ;;  %330 = vmatmul.mubr.msk.bf16.vlgmr.msra.gmra.mxu1 %vm114_vm1, %v357_v9 }
  0x17   :  { %325 = vmatprep.mubr.msk.bf16.mxu0 %vm114_vm1, %v358_v10  ;;  %333 = vmatprep.mubr.msk.bf16.mxu1 %vm114_vm1, %v359_v11 }
  0x1e   :  { %326 = vmatmul.mubr.msk.bf16.gmra.mxu0 %vm114_vm1, %v360_v12  ;;  %334 = vmatmul.mubr.msk.bf16.gmra.mxu1 %vm114_vm1, %v361_v13 }
  0xd6   :  { %v323_v15 = vpop.f32.mrf.mxu0  ;;  %v331_v16 = vpop.f32.mrf.mxu1 }
  0xd7   :  { %v186_v17 = vadd.f32 %v323_v15, %v276_v14  ;;  %v218_v18 = vadd.f32 %v331_v16, %v276_v14 }
  0xd8   :  { %v177_v19 = vpop.f32.mrf.mxu0  ;;  %v209_v20 = vpop.f32.mrf.mxu1 }
  0xd9   :  { %v242_v21 = vmax.f32 %v186_v17, 0.0  ;;  %v250_v22 = vmax.f32 %v218_v18, 0.0  ;;  %v178_v23 = vadd.f32 %v276_v14, %v177_v19  ;;  %v210_v24 = vadd.f32 %v276_v14, %v209_v20 }
  0xda   :  { %v324_v25 = vpop.f32.mrf.mxu0  ;;  %v332_v26 = vpop.f32.mrf.mxu1 }
  0xdb   :  { %258 = vst [vmem:[%s483_s3 + $0x10] sm:$0xff] %v242_v21  ;;  %266 = vst [vmem:[%s483_s3 + $0x50] sm:$0xff] %v250_v22  ;;  %v240_v27 = vmax.f32 %v178_v23, 0.0  ;;  %v248_v28 = vmax.f32 %v210_v24, 0.0  ;;  %v189_v29 = vadd.f32 %v324_v25, %v276_v14  ;;  %v221_v30 = vadd.f32 %v332_v26, %v276_v14 }
  0xdc   :  { %v180_v31 = vpop.f32.mrf.mxu0  ;;  %v212_v32 = vpop.f32.mrf.mxu1 }
  0xdd   :  { %256 = vst [vmem:[%s483_s3] sm:$0xff] %v240_v27  ;;  %264 = vst [vmem:[%s483_s3 + $0x40] sm:$0xff] %v248_v28  ;;  %v243_v33 = vmax.f32 %v189_v29, 0.0  ;;  %v251_v34 = vmax.f32 %v221_v30, 0.0  ;;  %v181_v35 = vadd.f32 %v276_v14, %v180_v31  ;;  %v213_v36 = vadd.f32 %v276_v14, %v212_v32 }
  0xde   :  { %v327_v37 = vpop.f32.mrf.mxu0  ;;  %v335_v38 = vpop.f32.mrf.mxu1 }
  0xdf   :  { %259 = vst [vmem:[%s483_s3 + $0x18] sm:$0xff] %v243_v33  ;;  %267 = vst [vmem:[%s483_s3 + $0x58] sm:$0xff] %v251_v34  ;;  %v241_v39 = vmax.f32 %v181_v35, 0.0  ;;  %v249_v40 = vmax.f32 %v213_v36, 0.0  ;;  %v202_v41 = vadd.f32 %v327_v37, %v276_v14  ;;  %v234_v42 = vadd.f32 %v335_v38, %v276_v14 }
  0xe0   :  { %v193_v43 = vpop.f32.mrf.mxu0  ;;  %v225_v44 = vpop.f32.mrf.mxu1 }
  0xe1   :  { %257 = vst [vmem:[%s483_s3 + $0x8] sm:$0xff] %v241_v39  ;;  %265 = vst [vmem:[%s483_s3 + $0x48] sm:$0xff] %v249_v40  ;;  %v246_v45 = vmax.f32 %v202_v41, 0.0  ;;  %v254_v46 = vmax.f32 %v234_v42, 0.0  ;;  %v194_v47 = vadd.f32 %v276_v14, %v193_v43  ;;  %v226_v48 = vadd.f32 %v276_v14, %v225_v44 }
  0xe2   :  { %v328_v49 = vpop.f32.mrf.mxu0  ;;  %v336_v50 = vpop.f32.mrf.mxu1 }
  0xe3   :  { %262 = vst [vmem:[%s483_s3 + $0x30] sm:$0xff] %v246_v45  ;;  %270 = vst [vmem:[%s483_s3 + $0x70] sm:$0xff] %v254_v46  ;;  %v244_v51 = vmax.f32 %v194_v47, 0.0  ;;  %v252_v52 = vmax.f32 %v226_v48, 0.0  ;;  %v205_v53 = vadd.f32 %v328_v49, %v276_v14  ;;  %v237_v54 = vadd.f32 %v336_v50, %v276_v14 }
  0xe4   :  { %v196_v55 = vpop.f32.mrf.mxu0  ;;  %v228_v56 = vpop.f32.mrf.mxu1 }
  0xe5   :  { %260 = vst [vmem:[%s483_s3 + $0x20] sm:$0xff] %v244_v51  ;;  %268 = vst [vmem:[%s483_s3 + $0x60] sm:$0xff] %v252_v52  ;;  %v247_v57 = vmax.f32 %v205_v53, 0.0  ;;  %v255_v58 = vmax.f32 %v237_v54, 0.0  ;;  %v197_v59 = vadd.f32 %v276_v14, %v196_v55  ;;  %v229_v60 = vadd.f32 %v276_v14, %v228_v56 }
  0xe7   :  { %263 = vst [vmem:[%s483_s3 + $0x38] sm:$0xff] %v247_v57  ;;  %271 = vst [vmem:[%s483_s3 + $0x78] sm:$0xff] %v255_v58  ;;  %v245_v61 = vmax.f32 %v197_v59, 0.0  ;;  %v253_v62 = vmax.f32 %v229_v60, 0.0 }
  0xe9   :  { %261 = vst [vmem:[%s483_s3 + $0x28] sm:$0xff] %v245_v61  ;;  %269 = vst [vmem:[%s483_s3 + $0x68] sm:$0xff] %v253_v62 }

// kernel: _lambda_.11
= control target key start
LH: loop header
LB: loop body
LE: loop exit
PB: predicated region body
PF: predicated region fallthrough
CT: control target
= control target key end

     0   :  { %v426_v0 = vmov 0   ;;  %vm182_vm0 = vcmask 130048   ;;  %s599_s1 = inlined_call_operand.vmem [shape: bf16[144,128], index: 1, kind: input, shape index: {}]   ;;  %s600_s0 = inlined_call_operand.vmem [shape: bf16[128,144], index: 0, kind: input, shape index: {}]   ;;  %s601_s2 = inlined_call_operand.vmem [shape: f32[1,128], index: 2, kind: input, shape index: {}]   ;;  %s602_s3 = inlined_call_operand.vmem [shape: f32[128,128], index: 3, kind: output, shape index: {}]  }
   0x1   :  { %207 = vmatprep.subr.bf16.mxu0 %v426_v0  ;;  %374 = vmatprep.subr.bf16.mxu1 %v426_v0  ;;  %v393_v1 = vld [vmem:[%s599_s1 + $0x38] sm:$0xff]   ;;  %v394_v2 = vld [vmem:[%s599_s1 + $0x30] sm:$0xff]   ;;  %v395_v3 = vld [vmem:[%s599_s1 + $0x28] sm:$0xff]  }
   0x2   :  { %208 = vmatpush1.bf16.msra.mxu0 %v393_v1  ;;  %383 = vmatpush1.bf16.msra.mxu1 %v393_v1  ;;  %v396_v4 = vld [vmem:[%s599_s1 + $0x20] sm:$0xff]   ;;  %v397_v7 = vld [vmem:[%s599_s1 + $0x18] sm:$0xff]   ;;  %v398_v8 = vld [vmem:[%s599_s1 + $0x10] sm:$0xff]  }
   0x3   :  { %209 = vmatprep.subr.bf16.mxu0 %v426_v0  ;;  %375 = vmatprep.subr.bf16.mxu1 %v426_v0  ;;  %v404_v5 = vld [vmem:[%s600_s0 + $0x4] ss:$8 sps:$4 sm:$0xff]   ;;  %v402_v12 = vld [vmem:[%s600_s0] ss:$8 sps:$4 sm:$0xff]   ;;  %v408_v14 = vld [vmem:[%s600_s0 + $0x14] ss:$8 sps:$4 sm:$0xff]  }
   0x4   :  { %v407_v6 = vld [vmem:[%s600_s0 + $0x44] ss:$8 sps:$4 sm:$0xff]   ;;  %366 = vmatprep.mubr.msk.bf16.mxu0 %vm182_vm0, %v404_v5  ;;  %v405_v13 = vld [vmem:[%s600_s0 + $0x40] ss:$8 sps:$4 sm:$0xff]   ;;  %v410_v15 = vld [vmem:[%s600_s0 + $0x54] ss:$8 sps:$4 sm:$0xff]  }
   0x5   :  { %370 = vmatprep.mubr.msk.bf16.mxu1 %vm182_vm0, %v407_v6  ;;  %v399_v9 = vld [vmem:[%s599_s1 + $0x8] sm:$0xff]   ;;  %v400_v10 = vld [vmem:[%s599_s1] sm:$0xff]   ;;  %v412_v16 = vld [vmem:[%s600_s0 + $0x10] ss:$8 sps:$4 sm:$0xff]  }
   0x6   :  { %210 = vmatpush1.bf16.msra.mxu0 %v394_v2  ;;  %384 = vmatpush1.bf16.msra.mxu1 %v394_v2  ;;  %v401_v11 = vld [vmem:[%s599_s1 + $0x40] sm:$0xff]   ;;  %v413_v17 = vld [vmem:[%s600_s0 + $0x50] ss:$8 sps:$4 sm:$0xff]   ;;  %v420_v22 = vld [vmem:[%s600_s0 + $0x34] ss:$8 sps:$4 sm:$0xff]  }
   0x7   :  { %211 = vmatprep.subr.bf16.mxu0 %v426_v0  ;;  %376 = vmatprep.subr.bf16.mxu1 %v426_v0  ;;  %v414_v18 = vld [vmem:[%s600_s0 + $0x24] ss:$8 sps:$4 sm:$0xff]   ;;  %v418_v20 = vld [vmem:[%s600_s0 + $0x20] ss:$8 sps:$4 sm:$0xff]   ;;  %v422_v23 = vld [vmem:[%s600_s0 + $0x74] ss:$8 sps:$4 sm:$0xff]  }
   0x8   :  { %v416_v19 = vld [vmem:[%s600_s0 + $0x64] ss:$8 sps:$4 sm:$0xff]   ;;  %v419_v21 = vld [vmem:[%s600_s0 + $0x60] ss:$8 sps:$4 sm:$0xff]   ;;  %v424_v24 = vld [vmem:[%s600_s0 + $0x30] ss:$8 sps:$4 sm:$0xff]  }
   0x9   :  { %v425_v25 = vld [vmem:[%s600_s0 + $0x70] ss:$8 sps:$4 sm:$0xff]   ;;  %v533_v26 = vld [vmem:[%s601_s2] ss:$0 sm:$0xff] }
   0xa   :  { %212 = vmatpush1.bf16.msra.mxu0 %v395_v3  ;;  %385 = vmatpush1.bf16.msra.mxu1 %v395_v3 }
   0xb   :  { %213 = vmatprep.subr.bf16.mxu0 %v426_v0  ;;  %377 = vmatprep.subr.bf16.mxu1 %v426_v0 }
   0xe   :  { %214 = vmatpush1.bf16.msra.mxu0 %v396_v4  ;;  %386 = vmatpush1.bf16.msra.mxu1 %v396_v4 }
   0xf   :  { %215 = vmatprep.subr.bf16.mxu0 %v426_v0  ;;  %378 = vmatprep.subr.bf16.mxu1 %v426_v0 }
  0x12   :  { %216 = vmatpush1.bf16.msra.mxu0 %v397_v7  ;;  %387 = vmatpush1.bf16.msra.mxu1 %v397_v7 }
  0x13   :  { %217 = vmatprep.subr.bf16.mxu0 %v426_v0  ;;  %379 = vmatprep.subr.bf16.mxu1 %v426_v0 }
  0x16   :  { %218 = vmatpush1.bf16.msra.mxu0 %v398_v8  ;;  %388 = vmatpush1.bf16.msra.mxu1 %v398_v8 }
  0x17   :  { %219 = vmatprep.subr.bf16.mxu0 %v426_v0  ;;  %380 = vmatprep.subr.bf16.mxu1 %v426_v0 }
  0x1a   :  { %220 = vmatpush1.bf16.msra.mxu0 %v399_v9  ;;  %389 = vmatpush1.bf16.msra.mxu1 %v399_v9 }
  0x1b   :  { %221 = vmatprep.subr.bf16.mxu0 %v426_v0  ;;  %381 = vmatprep.subr.bf16.mxu1 %v426_v0 }
  0x1e   :  { %222 = vmatpush1.bf16.msra.mxu0 %v400_v10  ;;  %390 = vmatpush1.bf16.msra.mxu1 %v400_v10 }
  0x1f   :  { %237 = vmatprep.subr.bf16.mxu0 %v426_v0  ;;  %382 = vmatprep.subr.bf16.mxu1 %v426_v0 }
  0x22   :  { %238 = vmatpush2.bf16.msra.mxu0 %v401_v11  ;;  %391 = vmatpush2.bf16.msra.mxu1 %v401_v11 }
  0x25   :  { %240 = vmatmul.mubr.bf16.vlgmr.msra.gmra.mxu0 %v402_v12  ;;  %272 = vmatmul.mubr.bf16.vlgmr.msra.gmra.mxu1 %v405_v13 }
  0x26   :  { %367 = vmatprep.mubr.msk.bf16.mxu0 %vm182_vm0, %v408_v14  ;;  %371 = vmatprep.mubr.msk.bf16.mxu1 %vm182_vm0, %v410_v15 }
  0x2d   :  { %248 = vmatmul.mubr.bf16.gmra.mxu0 %v412_v16  ;;  %280 = vmatmul.mubr.bf16.gmra.mxu1 %v413_v17 }
  0x2e   :  { %368 = vmatprep.mubr.msk.bf16.mxu0 %vm182_vm0, %v414_v18  ;;  %372 = vmatprep.mubr.msk.bf16.mxu1 %vm182_vm0, %v416_v19 }
  0x35   :  { %256 = vmatmul.mubr.bf16.gmra.mxu0 %v418_v20  ;;  %288 = vmatmul.mubr.bf16.gmra.mxu1 %v419_v21 }
  0x36   :  { %369 = vmatprep.mubr.msk.bf16.mxu0 %vm182_vm0, %v420_v22  ;;  %373 = vmatprep.mubr.msk.bf16.mxu1 %vm182_vm0, %v422_v23 }
  0x3d   :  { %264 = vmatmul.mubr.bf16.gmra.mxu0 %v424_v24  ;;  %296 = vmatmul.mubr.bf16.gmra.mxu1 %v425_v25 }
  0xe5   :  { %v241_v27 = vpop.f32.mrf.mxu0  ;;  %v273_v28 = vpop.f32.mrf.mxu1 }
  0xe6   :  { %v242_v29 = vadd.f32 %v533_v26, %v241_v27  ;;  %v274_v30 = vadd.f32 %v533_v26, %v273_v28 }
  0xe7   :  { %v243_v31 = vpop.f32.mrf.mxu0  ;;  %v275_v32 = vpop.f32.mrf.mxu1 }
  0xe8   :  { %v304_v33 = vmax.f32 %v242_v29, 0.0  ;;  %v312_v34 = vmax.f32 %v274_v30, 0.0 }
  0xe9   :  { %v244_v35 = vpop.f32.mrf.mxu0  ;;  %v276_v36 = vpop.f32.mrf.mxu1 }
  0xea   :  { %320 = vst [vmem:[%s602_s3] sm:$0xff] %v304_v33  ;;  %328 = vst [vmem:[%s602_s3 + $0x40] sm:$0xff] %v312_v34  ;;  %v245_v37 = vadd.f32 %v533_v26, %v244_v35  ;;  %v277_v38 = vadd.f32 %v533_v26, %v276_v36 }
  0xeb   :  { %v246_v39 = vpop.f32.mrf.mxu0  ;;  %v278_v40 = vpop.f32.mrf.mxu1 }
  0xec   :  { %v305_v41 = vmax.f32 %v245_v37, 0.0  ;;  %v313_v42 = vmax.f32 %v277_v38, 0.0 }
  0xed   :  { %v249_v43 = vpop.f32.mrf.mxu0  ;;  %v281_v44 = vpop.f32.mrf.mxu1 }
  0xee   :  { %321 = vst [vmem:[%s602_s3 + $0x8] sm:$0xff] %v305_v41  ;;  %329 = vst [vmem:[%s602_s3 + $0x48] sm:$0xff] %v313_v42  ;;  %v250_v45 = vadd.f32 %v533_v26, %v249_v43  ;;  %v282_v46 = vadd.f32 %v533_v26, %v281_v44 }
  0xef   :  { %v251_v47 = vpop.f32.mrf.mxu0  ;;  %v283_v48 = vpop.f32.mrf.mxu1 }
  0xf0   :  { %v306_v49 = vmax.f32 %v250_v45, 0.0  ;;  %v314_v50 = vmax.f32 %v282_v46, 0.0 }
  0xf1   :  { %v252_v51 = vpop.f32.mrf.mxu0  ;;  %v284_v52 = vpop.f32.mrf.mxu1 }
  0xf2   :  { %322 = vst [vmem:[%s602_s3 + $0x10] sm:$0xff] %v306_v49  ;;  %330 = vst [vmem:[%s602_s3 + $0x50] sm:$0xff] %v314_v50  ;;  %v253_v53 = vadd.f32 %v533_v26, %v252_v51  ;;  %v285_v54 = vadd.f32 %v533_v26, %v284_v52 }
  0xf3   :  { %v254_v55 = vpop.f32.mrf.mxu0  ;;  %v286_v56 = vpop.f32.mrf.mxu1 }
  0xf4   :  { %v307_v57 = vmax.f32 %v253_v53, 0.0  ;;  %v315_v58 = vmax.f32 %v285_v54, 0.0 }
  0xf5   :  { %v257_v59 = vpop.f32.mrf.mxu0  ;;  %v289_v60 = vpop.f32.mrf.mxu1 }
  0xf6   :  { %323 = vst [vmem:[%s602_s3 + $0x18] sm:$0xff] %v307_v57  ;;  %331 = vst [vmem:[%s602_s3 + $0x58] sm:$0xff] %v315_v58  ;;  %v258_v61 = vadd.f32 %v533_v26, %v257_v59  ;;  %v290_v62 = vadd.f32 %v533_v26, %v289_v60 }
  0xf7   :  { %v259_v63 = vpop.f32.mrf.mxu0  ;;  %v291_v0 = vpop.f32.mrf.mxu1 }
  0xf8   :  { %v308_v1 = vmax.f32 %v258_v61, 0.0  ;;  %v316_v2 = vmax.f32 %v290_v62, 0.0 }
  0xf9   :  { %v260_v3 = vpop.f32.mrf.mxu0  ;;  %v292_v4 = vpop.f32.mrf.mxu1 }
  0xfa   :  { %324 = vst [vmem:[%s602_s3 + $0x20] sm:$0xff] %v308_v1  ;;  %332 = vst [vmem:[%s602_s3 + $0x60] sm:$0xff] %v316_v2  ;;  %v261_v5 = vadd.f32 %v533_v26, %v260_v3  ;;  %v293_v6 = vadd.f32 %v533_v26, %v292_v4 }
  0xfb   :  { %v262_v7 = vpop.f32.mrf.mxu0  ;;  %v294_v8 = vpop.f32.mrf.mxu1 }
  0xfc   :  { %v309_v9 = vmax.f32 %v261_v5, 0.0  ;;  %v317_v10 = vmax.f32 %v293_v6, 0.0 }
  0xfd   :  { %v265_v11 = vpop.f32.mrf.mxu0  ;;  %v297_v12 = vpop.f32.mrf.mxu1 }
  0xfe   :  { %325 = vst [vmem:[%s602_s3 + $0x28] sm:$0xff] %v309_v9  ;;  %333 = vst [vmem:[%s602_s3 + $0x68] sm:$0xff] %v317_v10  ;;  %v266_v13 = vadd.f32 %v533_v26, %v265_v11  ;;  %v298_v14 = vadd.f32 %v533_v26, %v297_v12 }
  0xff   :  { %v267_v15 = vpop.f32.mrf.mxu0  ;;  %v299_v16 = vpop.f32.mrf.mxu1 }
 0x100   :  { %v310_v17 = vmax.f32 %v266_v13, 0.0  ;;  %v318_v18 = vmax.f32 %v298_v14, 0.0 }
 0x101   :  { %v268_v19 = vpop.f32.mrf.mxu0  ;;  %v300_v20 = vpop.f32.mrf.mxu1 }
 0x102   :  { %326 = vst [vmem:[%s602_s3 + $0x30] sm:$0xff] %v310_v17  ;;  %334 = vst [vmem:[%s602_s3 + $0x70] sm:$0xff] %v318_v18  ;;  %v269_v21 = vadd.f32 %v533_v26, %v268_v19  ;;  %v301_v22 = vadd.f32 %v533_v26, %v300_v20 }
 0x103   :  { %v270_v23 = vpop.f32.mrf.mxu0  ;;  %v302_v24 = vpop.f32.mrf.mxu1 }
 0x104   :  { %v311_v25 = vmax.f32 %v269_v21, 0.0  ;;  %v319_v27 = vmax.f32 %v301_v22, 0.0 }
 0x106   :  { %327 = vst [vmem:[%s602_s3 + $0x38] sm:$0xff] %v311_v25  ;;  %335 = vst [vmem:[%s602_s3 + $0x78] sm:$0xff] %v319_v27 }

// kernel: _lambda_.12
= control target key start
LH: loop header
LB: loop body
LE: loop exit
PB: predicated region body
PF: predicated region fallthrough
CT: control target
= control target key end

     0   :  { %v234_v0 = vmov 0   ;;  %vm116_vm0 = vcmask 130048   ;;  %s309_s1 = inlined_call_operand.vmem [shape: bf16[144,128], index: 1, kind: input, shape index: {}]   ;;  %s310_s0 = inlined_call_operand.vmem [shape: bf16[32,144], index: 0, kind: input, shape index: {}]   ;;  %s311_s2 = inlined_call_operand.vmem [shape: f32[1,128], index: 2, kind: input, shape index: {}]   ;;  %s312_s3 = inlined_call_operand.vmem [shape: f32[32,128], index: 3, kind: output, shape index: {}]  }
   0x1   :  { %123 = vmatprep.subr.bf16.mxu0 %v234_v0  ;;  %200 = vmatprep.subr.bf16.mxu1 %v234_v0  ;;  %v219_v1 = vld [vmem:[%s309_s1 + $0x38] sm:$0xff]   ;;  %v220_v2 = vld [vmem:[%s309_s1 + $0x30] sm:$0xff]   ;;  %v221_v3 = vld [vmem:[%s309_s1 + $0x28] sm:$0xff]  }
   0x2   :  { %124 = vmatpush1.bf16.msra.mxu0 %v219_v1  ;;  %209 = vmatpush1.bf16.msra.mxu1 %v219_v1  ;;  %v222_v4 = vld [vmem:[%s309_s1 + $0x20] sm:$0xff]   ;;  %v233_v6 = vld [vmem:[%s310_s0 + $0x14] ss:$8 sps:$4 sm:$0xff]   ;;  %v225_v9 = vld [vmem:[%s309_s1 + $0x8] sm:$0xff]  }
   0x3   :  { %125 = vmatprep.subr.bf16.mxu0 %v234_v0  ;;  %201 = vmatprep.subr.bf16.mxu1 %v234_v0  ;;  %v230_v5 = vld [vmem:[%s310_s0 + $0x4] ss:$8 sps:$4 sm:$0xff]   ;;  %v223_v7 = vld [vmem:[%s309_s1 + $0x18] sm:$0xff]   ;;  %v224_v8 = vld [vmem:[%s309_s1 + $0x10] sm:$0xff]  }
   0x4   :  { %198 = vmatprep.mubr.msk.bf16.mxu0 %vm116_vm0, %v230_v5  ;;  %199 = vmatprep.mubr.msk.bf16.mxu1 %vm116_vm0, %v233_v6  ;;  %v226_v10 = vld [vmem:[%s309_s1] sm:$0xff]   ;;  %v231_v13 = vld [vmem:[%s310_s0 + $0x10] ss:$8 sps:$4 sm:$0xff]  }
   0x5   :  { %v227_v11 = vld [vmem:[%s309_s1 + $0x40] sm:$0xff]  }
   0x6   :  { %126 = vmatpush1.bf16.msra.mxu0 %v220_v2  ;;  %210 = vmatpush1.bf16.msra.mxu1 %v220_v2  ;;  %v228_v12 = vld [vmem:[%s310_s0] ss:$8 sps:$4 sm:$0xff]  }
   0x7   :  { %127 = vmatprep.subr.bf16.mxu0 %v234_v0  ;;  %202 = vmatprep.subr.bf16.mxu1 %v234_v0  ;;  %v184_v14 = vld [vmem:[%s311_s2] ss:$0 sm:$0xff] }
   0xa   :  { %128 = vmatpush1.bf16.msra.mxu0 %v221_v3  ;;  %211 = vmatpush1.bf16.msra.mxu1 %v221_v3 }
   0xb   :  { %129 = vmatprep.subr.bf16.mxu0 %v234_v0  ;;  %203 = vmatprep.subr.bf16.mxu1 %v234_v0 }
   0xe   :  { %130 = vmatpush1.bf16.msra.mxu0 %v222_v4  ;;  %212 = vmatpush1.bf16.msra.mxu1 %v222_v4 }
   0xf   :  { %131 = vmatprep.subr.bf16.mxu0 %v234_v0  ;;  %204 = vmatprep.subr.bf16.mxu1 %v234_v0 }
  0x12   :  { %132 = vmatpush1.bf16.msra.mxu0 %v223_v7  ;;  %213 = vmatpush1.bf16.msra.mxu1 %v223_v7 }
  0x13   :  { %133 = vmatprep.subr.bf16.mxu0 %v234_v0  ;;  %205 = vmatprep.subr.bf16.mxu1 %v234_v0 }
  0x16   :  { %134 = vmatpush1.bf16.msra.mxu0 %v224_v8  ;;  %214 = vmatpush1.bf16.msra.mxu1 %v224_v8 }
  0x17   :  { %135 = vmatprep.subr.bf16.mxu0 %v234_v0  ;;  %206 = vmatprep.subr.bf16.mxu1 %v234_v0 }
  0x1a   :  { %136 = vmatpush1.bf16.msra.mxu0 %v225_v9  ;;  %215 = vmatpush1.bf16.msra.mxu1 %v225_v9 }
  0x1b   :  { %137 = vmatprep.subr.bf16.mxu0 %v234_v0  ;;  %207 = vmatprep.subr.bf16.mxu1 %v234_v0 }
  0x1e   :  { %138 = vmatpush1.bf16.msra.mxu0 %v226_v10  ;;  %216 = vmatpush1.bf16.msra.mxu1 %v226_v10 }
  0x1f   :  { %153 = vmatprep.subr.bf16.mxu0 %v234_v0  ;;  %208 = vmatprep.subr.bf16.mxu1 %v234_v0 }
  0x22   :  { %154 = vmatpush2.bf16.msra.mxu0 %v227_v11  ;;  %217 = vmatpush2.bf16.msra.mxu1 %v227_v11 }
  0x25   :  { %156 = vmatmul.mubr.bf16.vlgmr.msra.gmra.mxu0 %v228_v12  ;;  %164 = vmatmul.mubr.bf16.vlgmr.msra.gmra.mxu1 %v231_v13 }
  0xe5   :  { %v157_v15 = vpop.f32.mrf.mxu0  ;;  %v165_v16 = vpop.f32.mrf.mxu1 }
  0xe6   :  { %v158_v17 = vadd.f32 %v184_v14, %v157_v15  ;;  %v166_v18 = vadd.f32 %v184_v14, %v165_v16 }
  0xe7   :  { %v159_v19 = vpop.f32.mrf.mxu0  ;;  %v167_v20 = vpop.f32.mrf.mxu1 }
  0xe8   :  { %v172_v21 = vmax.f32 %v158_v17, 0.0  ;;  %v174_v22 = vmax.f32 %v166_v18, 0.0 }
  0xe9   :  { %v160_v23 = vpop.f32.mrf.mxu0  ;;  %v168_v24 = vpop.f32.mrf.mxu1 }
  0xea   :  { %176 = vst [vmem:[%s312_s3] sm:$0xff] %v172_v21  ;;  %178 = vst [vmem:[%s312_s3 + $0x10] sm:$0xff] %v174_v22  ;;  %v161_v25 = vadd.f32 %v184_v14, %v160_v23  ;;  %v169_v26 = vadd.f32 %v184_v14, %v168_v24 }
  0xeb   :  { %v162_v27 = vpop.f32.mrf.mxu0  ;;  %v170_v28 = vpop.f32.mrf.mxu1 }
  0xec   :  { %v173_v29 = vmax.f32 %v161_v25, 0.0  ;;  %v175_v30 = vmax.f32 %v169_v26, 0.0 }
  0xee   :  { %177 = vst [vmem:[%s312_s3 + $0x8] sm:$0xff] %v173_v29  ;;  %179 = vst [vmem:[%s312_s3 + $0x18] sm:$0xff] %v175_v30 }

// kernel: _lambda_.13
= control target key start
LH: loop header
LB: loop body
LE: loop exit
PB: predicated region body
PF: predicated region fallthrough
CT: control target
= control target key end

     0   :  { %vm204_vm0 = vcmask 261120   ;;  %s521_s1 = inlined_call_operand.vmem [shape: bf16[288,128], index: 1, kind: input, shape index: {}]   ;;  %s522_s0 = inlined_call_operand.vmem [shape: bf16[32,288], index: 0, kind: input, shape index: {}]   ;;  %s523_s2 = inlined_call_operand.vmem [shape: f32[1,128], index: 2, kind: input, shape index: {}]   ;;  %s524_s3 = inlined_call_operand.vmem [shape: f32[32,128], index: 3, kind: output, shape index: {}]  }
   0x1   :  { %v388_v0 = vld [vmem:[%s521_s1 + $0x78] sm:$0xff]   ;;  %v390_v2 = vld [vmem:[%s521_s1 + $0x70] sm:$0xff]   ;;  %v392_v4 = vld [vmem:[%s521_s1 + $0x68] sm:$0xff]  }
   0x2   :  { %v389_v1 = vld [vmem:[%s521_s1 + $0x38] sm:$0xff]   ;;  %348 = vmatprep.subr.bf16.mxu0 %v388_v0  ;;  %v391_v3 = vld [vmem:[%s521_s1 + $0x30] sm:$0xff]   ;;  %v393_v5 = vld [vmem:[%s521_s1 + $0x28] sm:$0xff]  }
   0x3   :  { %349 = vmatpush3.bf16.msra.mxu0 %v389_v1  ;;  %v394_v6 = vld [vmem:[%s521_s1 + $0x60] sm:$0xff]   ;;  %v396_v8 = vld [vmem:[%s521_s1 + $0x58] sm:$0xff]   ;;  %v403_v10 = vld [vmem:[%s521_s1 + $0x88] sm:$0xff]  }
   0x4   :  { %350 = vmatprep.subr.bf16.mxu0 %v390_v2  ;;  %v395_v7 = vld [vmem:[%s521_s1 + $0x20] sm:$0xff]   ;;  %v397_v9 = vld [vmem:[%s521_s1 + $0x18] sm:$0xff]   ;;  %v398_v11 = vld [vmem:[%s521_s1 + $0x50] sm:$0xff]   ;;  %380 = vmatprep.subr.bf16.mxu1 %v403_v10 }
   0x5   :  { %v399_v12 = vld [vmem:[%s521_s1 + $0x10] sm:$0xff]   ;;  %v400_v13 = vld [vmem:[%s521_s1 + $0x48] sm:$0xff]   ;;  %381 = vmatpush3.bf16.msra.mxu1 %v403_v10  ;;  %v408_v15 = vld [vmem:[%s521_s1 + $0x80] sm:$0xff]  }
   0x6   :  { %v407_v14 = vld [vmem:[%s522_s0 + $0x4] ss:$12 sps:$4 sm:$0xff]   ;;  %v409_v16 = vld [vmem:[%s522_s0 + $0x8] ss:$12 sps:$4 sm:$0xff]   ;;  %382 = vmatprep.subr.bf16.mxu1 %v408_v15  ;;  %v410_v17 = vld [vmem:[%s522_s0 + $0x20] ss:$12 sps:$4 sm:$0xff]  }
   0x7   :  { %351 = vmatpush3.bf16.msra.mxu0 %v391_v3  ;;  %243 = vmatprep.mubr.bf16.mxu0 %v407_v14  ;;  %v401_v18 = vld [vmem:[%s521_s1 + $0x8] sm:$0xff]   ;;  %v402_v19 = vld [vmem:[%s521_s1 + $0x40] sm:$0xff]  }
   0x8   :  { %352 = vmatprep.subr.bf16.mxu0 %v392_v4  ;;  %384 = vmatprep.mubr.msk.bf16.mxu1 %vm204_vm0, %v409_v16  ;;  %v404_v20 = vld [vmem:[%s521_s1] sm:$0xff]   ;;  %v411_v22 = vld [vmem:[%s522_s0 + $0x1c] ss:$12 sps:$4 sm:$0xff]  }
   0x9   :  { %383 = vmatpush3.bf16.msra.mxu1 %v408_v15  ;;  %v405_v21 = vld [vmem:[%s522_s0] ss:$12 sps:$4 sm:$0xff]   ;;  %v413_v23 = vld [vmem:[%s522_s0 + $0x18] ss:$12 sps:$4 sm:$0xff]  }
   0xa   :  { %v321_v28 = vld [vmem:[%s523_s2] ss:$0 sm:$0xff] }
   0xb   :  { %353 = vmatpush3.bf16.msra.mxu0 %v393_v5 }
   0xc   :  { %354 = vmatprep.subr.bf16.mxu0 %v394_v6  ;;  %385 = vmatmul.mubr.msk.bf16.vlgmr.msra.gmra.mxu1 %vm204_vm0, %v410_v17 }
   0xf   :  { %355 = vmatpush3.bf16.msra.mxu0 %v395_v7 }
  0x10   :  { %356 = vmatprep.subr.bf16.mxu0 %v396_v8 }
  0x13   :  { %357 = vmatpush3.bf16.msra.mxu0 %v397_v9 }
  0x14   :  { %358 = vmatprep.subr.bf16.mxu0 %v398_v11 }
  0x17   :  { %359 = vmatpush3.bf16.msra.mxu0 %v399_v12 }
  0x18   :  { %360 = vmatprep.subr.bf16.mxu0 %v400_v13 }
  0x1b   :  { %361 = vmatpush3.bf16.msra.mxu0 %v401_v18 }
  0x1c   :  { %362 = vmatprep.subr.bf16.mxu0 %v402_v19 }
  0x1f   :  { %363 = vmatpush3.bf16.msra.mxu0 %v404_v20 }
  0x22   :  { %244 = vmatmul.mubr.bf16.vlgmr.msra.gmra.mxu0 %v405_v21 }
  0x23   :  { %251 = vmatprep.mubr.bf16.mxu0 %v411_v22 }
  0x2a   :  { %252 = vmatmul.mubr.bf16.gmra.mxu0 %v413_v23 }
  0xcc   :  { %v386_v24 = vpop.f32.mrf.mxu1 }
  0xce   :  { %v294_v26 = vpop.f32.mrf.mxu1 }
  0xd0   :  { %v387_v31 = vpop.f32.mrf.mxu1 }
  0xd2   :  { %v297_v37 = vpop.f32.mrf.mxu1 }
  0xe2   :  { %v364_v25 = vpop.f32.mrf.mxu0 }
  0xe4   :  { %v365_v27 = vpop.f32.mrf.mxu0 }
  0xe5   :  { %v366_v29 = vadd.f32 %v365_v27, %v364_v25 }
  0xe6   :  { %v367_v30 = vpop.f32.mrf.mxu0 }
  0xe7   :  { %v246_v32 = vadd.f32 %v366_v29, %v321_v28 }
  0xe8   :  { %v368_v33 = vpop.f32.mrf.mxu0 }
  0xe9   :  { %v369_v34 = vadd.f32 %v368_v33, %v367_v30  ;;  %v295_v35 = vadd.f32 %v294_v26, %v246_v32 }
  0xea   :  { %v370_v36 = vpop.f32.mrf.mxu0 }
  0xeb   :  { %v309_v38 = vmax.f32 %v295_v35, 0.0  ;;  %v249_v39 = vadd.f32 %v369_v34, %v321_v28 }
  0xec   :  { %v371_v40 = vpop.f32.mrf.mxu0 }
  0xed   :  { %313 = vst [vmem:[%s524_s3] sm:$0xff] %v309_v38  ;;  %v372_v41 = vadd.f32 %v371_v40, %v370_v36  ;;  %v298_v42 = vadd.f32 %v297_v37, %v249_v39 }
  0xee   :  { %v373_v43 = vpop.f32.mrf.mxu0 }
  0xef   :  { %v254_v44 = vadd.f32 %v372_v41, %v321_v28  ;;  %v310_v45 = vmax.f32 %v298_v42, 0.0 }
  0xf0   :  { %v374_v46 = vpop.f32.mrf.mxu0 }
  0xf1   :  { %v303_v47 = vadd.f32 %v386_v24, %v254_v44  ;;  %314 = vst [vmem:[%s524_s3 + $0x8] sm:$0xff] %v310_v45  ;;  %v375_v48 = vadd.f32 %v374_v46, %v373_v43 }
  0xf3   :  { %v311_v49 = vmax.f32 %v303_v47, 0.0  ;;  %v257_v50 = vadd.f32 %v375_v48, %v321_v28 }
  0xf5   :  { %315 = vst [vmem:[%s524_s3 + $0x10] sm:$0xff] %v311_v49  ;;  %v306_v51 = vadd.f32 %v387_v31, %v257_v50 }
  0xf7   :  { %v312_v52 = vmax.f32 %v306_v51, 0.0 }
  0xf9   :  { %316 = vst [vmem:[%s524_s3 + $0x18] sm:$0xff] %v312_v52 }

// kernel: _lambda_.14
= control target key start
LH: loop header
LB: loop body
LE: loop exit
PB: predicated region body
PF: predicated region fallthrough
CT: control target
= control target key end

     0   :  { %v359_v1 = vmov 0.0   ;;  %vm360_vm0 = vmmov 0   ;;  %vm185_vm1 = vcmask 261120   ;;  %s453_s1 = inlined_call_operand.vmem [shape: bf16[288,128], index: 1, kind: input, shape index: {}]   ;;  %s454_s0 = inlined_call_operand.vmem [shape: bf16[16,288], index: 0, kind: input, shape index: {}]   ;;  %s455_s2 = inlined_call_operand.vmem [shape: f32[1,128], index: 2, kind: input, shape index: {}]   ;;  %s456_s3 = inlined_call_operand.vmem [shape: f32[16,128], index: 3, kind: output, shape index: {}]  }
   0x1   :  { %v337_v0 = vld [vmem:[%s453_s1 + $0x78] sm:$0xff]   ;;  %327 = vmatprep.subr.bf16.mxu1 %v359_v1  ;;  %331 = vmatprep.mubr.msk.bf16.mxu1 %vm360_vm0, %v359_v1  ;;  %v339_v3 = vld [vmem:[%s453_s1 + $0x70] sm:$0xff]   ;;  %v341_v5 = vld [vmem:[%s453_s1 + $0x68] sm:$0xff]  }
   0x2   :  { %v338_v2 = vld [vmem:[%s453_s1 + $0x38] sm:$0xff]   ;;  %302 = vmatprep.subr.bf16.mxu0 %v337_v0  ;;  %v340_v4 = vld [vmem:[%s453_s1 + $0x30] sm:$0xff]   ;;  %v342_v6 = vld [vmem:[%s453_s1 + $0x28] sm:$0xff]  }
   0x3   :  { %303 = vmatpush3.bf16.msra.mxu0 %v338_v2  ;;  %v343_v7 = vld [vmem:[%s453_s1 + $0x60] sm:$0xff]   ;;  %v345_v9 = vld [vmem:[%s453_s1 + $0x58] sm:$0xff]   ;;  %v351_v10 = vld [vmem:[%s453_s1 + $0x88] sm:$0xff]  }
   0x4   :  { %304 = vmatprep.subr.bf16.mxu0 %v339_v3  ;;  %v344_v8 = vld [vmem:[%s453_s1 + $0x20] sm:$0xff]   ;;  %v346_v11 = vld [vmem:[%s453_s1 + $0x18] sm:$0xff]   ;;  %v347_v12 = vld [vmem:[%s453_s1 + $0x50] sm:$0xff]   ;;  %328 = vmatpush3.bf16.msra.mxu1 %v351_v10 }
   0x5   :  { %329 = vmatprep.subr.bf16.mxu1 %v359_v1  ;;  %v354_v13 = vld [vmem:[%s453_s1 + $0x80] sm:$0xff]   ;;  %v348_v14 = vld [vmem:[%s453_s1 + $0x10] sm:$0xff]   ;;  %v349_v16 = vld [vmem:[%s453_s1 + $0x48] sm:$0xff]  }
   0x6   :  { %v357_v15 = vld [vmem:[%s454_s0 + $0x4] ss:$12 sps:$4 sm:$0xff]   ;;  %v358_v17 = vld [vmem:[%s454_s0 + $0x8] ss:$12 sps:$4 sm:$0xff]   ;;  %v355_v21 = vld [vmem:[%s454_s0] ss:$12 sps:$4 sm:$0xff]  }
   0x7   :  { %305 = vmatpush3.bf16.msra.mxu0 %v340_v4  ;;  %221 = vmatprep.mubr.bf16.mxu0 %v357_v15  ;;  %v350_v18 = vld [vmem:[%s453_s1 + $0x8] sm:$0xff]   ;;  %v352_v19 = vld [vmem:[%s453_s1 + $0x40] sm:$0xff]  }
   0x8   :  { %306 = vmatprep.subr.bf16.mxu0 %v341_v5  ;;  %330 = vmatpush3.bf16.msra.mxu1 %v354_v13  ;;  %v353_v20 = vld [vmem:[%s453_s1] sm:$0xff]  }
   0x9   :  { %v279_v27 = vld [vmem:[%s455_s2] ss:$0 sm:$0xff] }
   0xb   :  { %307 = vmatpush3.bf16.msra.mxu0 %v342_v6  ;;  %332 = vmatmul.mubr.msk.bf16.vlgmr.msra.gmra.mxu1 %vm185_vm1, %v358_v17 }
   0xc   :  { %308 = vmatprep.subr.bf16.mxu0 %v343_v7 }
   0xf   :  { %309 = vmatpush3.bf16.msra.mxu0 %v344_v8 }
  0x10   :  { %310 = vmatprep.subr.bf16.mxu0 %v345_v9 }
  0x13   :  { %311 = vmatpush3.bf16.msra.mxu0 %v346_v11 }
  0x14   :  { %312 = vmatprep.subr.bf16.mxu0 %v347_v12 }
  0x17   :  { %313 = vmatpush3.bf16.msra.mxu0 %v348_v14 }
  0x18   :  { %314 = vmatprep.subr.bf16.mxu0 %v349_v16 }
  0x1b   :  { %315 = vmatpush3.bf16.msra.mxu0 %v350_v18 }
  0x1c   :  { %316 = vmatprep.subr.bf16.mxu0 %v352_v19 }
  0x1f   :  { %317 = vmatpush3.bf16.msra.mxu0 %v353_v20 }
  0x22   :  { %222 = vmatmul.mubr.bf16.vlgmr.msra.gmra.mxu0 %v355_v21 }
  0xcb   :  { %v264_v22 = vpop.f32.mrf.mxu1 }
  0xcd   :  { %v333_v23 = vpop.f32.mrf.mxu1 }
  0xcf   :  { %v267_v24 = vpop.f32.mrf.mxu1 }
  0xd1   :  { %v334_v25 = vpop.f32.mrf.mxu1 }
  0xe2   :  { %v318_v26 = vpop.f32.mrf.mxu0 }
  0xe4   :  { %v319_v28 = vpop.f32.mrf.mxu0 }
  0xe5   :  { %v320_v29 = vadd.f32 %v319_v28, %v318_v26 }
  0xe6   :  { %v321_v30 = vpop.f32.mrf.mxu0 }
  0xe7   :  { %v224_v31 = vadd.f32 %v320_v29, %v279_v27 }
  0xe8   :  { %v322_v32 = vpop.f32.mrf.mxu0 }
  0xe9   :  { %v265_v33 = vadd.f32 %v264_v22, %v224_v31  ;;  %v323_v34 = vadd.f32 %v322_v32, %v321_v30 }
  0xeb   :  { %v271_v35 = vmax.f32 %v265_v33, 0.0  ;;  %v227_v36 = vadd.f32 %v323_v34, %v279_v27 }
  0xed   :  { %273 = vst [vmem:[%s456_s3] sm:$0xff] %v271_v35  ;;  %v268_v37 = vadd.f32 %v267_v24, %v227_v36 }
  0xef   :  { %v272_v38 = vmax.f32 %v268_v37, 0.0 }
  0xf1   :  { %274 = vst [vmem:[%s456_s3 + $0x8] sm:$0xff] %v272_v38 }

// kernel: _lambda_.15
= control target key start
LH: loop header
LB: loop body
LE: loop exit
PB: predicated region body
PF: predicated region fallthrough
CT: control target
= control target key end

     0   :  { %v625_v33 = vmov 0.0   ;;  %vm626_vm0 = vmmov 0   ;;  %vm341_vm1 = vcmask 523264   ;;  %s779_s1 = inlined_call_operand.vmem [shape: bf16[576,128], index: 1, kind: input, shape index: {}]   ;;  %s780_s0 = inlined_call_operand.vmem [shape: bf16[16,576], index: 0, kind: input, shape index: {}]   ;;  %s781_s2 = inlined_call_operand.vmem [shape: f32[1,128], index: 2, kind: input, shape index: {}]   ;;  %s782_s3 = inlined_call_operand.vmem [shape: f32[16,128], index: 3, kind: output, shape index: {}]  }
   0x1   :  { %v582_v0 = vld [vmem:[%s779_s1 + $0x78] sm:$0xff]   ;;  %v586_v4 = vld [vmem:[%s779_s1 + $0x70] sm:$0xff]   ;;  %v590_v8 = vld [vmem:[%s779_s1 + $0x68] sm:$0xff]  }
   0x2   :  { %v583_v1 = vld [vmem:[%s779_s1 + $0x38] sm:$0xff]   ;;  %519 = vmatprep.subr.bf16.mxu0 %v582_v0  ;;  %v587_v5 = vld [vmem:[%s779_s1 + $0x30] sm:$0xff]   ;;  %v591_v9 = vld [vmem:[%s779_s1 + $0x28] sm:$0xff]  }
   0x3   :  { %v584_v2 = vld [vmem:[%s779_s1 + $0xf8] sm:$0xff]   ;;  %520 = vmatpush3.bf16.msra.mxu0 %v583_v1  ;;  %v588_v6 = vld [vmem:[%s779_s1 + $0xf0] sm:$0xff]   ;;  %v592_v10 = vld [vmem:[%s779_s1 + $0xe8] sm:$0xff]  }
   0x4   :  { %v585_v3 = vld [vmem:[%s779_s1 + $0xb8] sm:$0xff]   ;;  %541 = vmatprep.subr.bf16.mxu1 %v584_v2  ;;  %521 = vmatprep.subr.bf16.mxu0 %v586_v4  ;;  %v589_v7 = vld [vmem:[%s779_s1 + $0xb0] sm:$0xff]   ;;  %v593_v11 = vld [vmem:[%s779_s1 + $0xa8] sm:$0xff]  }
   0x5   :  { %542 = vmatpush3.bf16.msra.mxu1 %v585_v3  ;;  %v594_v12 = vld [vmem:[%s779_s1 + $0x60] sm:$0xff]   ;;  %v598_v16 = vld [vmem:[%s779_s1 + $0x58] sm:$0xff]   ;;  %v602_v20 = vld [vmem:[%s779_s1 + $0x50] sm:$0xff]  }
   0x6   :  { %543 = vmatprep.subr.bf16.mxu1 %v588_v6  ;;  %v595_v13 = vld [vmem:[%s779_s1 + $0x20] sm:$0xff]   ;;  %v599_v17 = vld [vmem:[%s779_s1 + $0x18] sm:$0xff]   ;;  %v603_v21 = vld [vmem:[%s779_s1 + $0x10] sm:$0xff]  }
   0x7   :  { %522 = vmatpush3.bf16.msra.mxu0 %v587_v5  ;;  %v596_v14 = vld [vmem:[%s779_s1 + $0xe0] sm:$0xff]   ;;  %v600_v18 = vld [vmem:[%s779_s1 + $0xd8] sm:$0xff]   ;;  %v604_v22 = vld [vmem:[%s779_s1 + $0xd0] sm:$0xff]  }
   0x8   :  { %523 = vmatprep.subr.bf16.mxu0 %v590_v8  ;;  %v597_v15 = vld [vmem:[%s779_s1 + $0xa0] sm:$0xff]   ;;  %v601_v19 = vld [vmem:[%s779_s1 + $0x98] sm:$0xff]   ;;  %v605_v23 = vld [vmem:[%s779_s1 + $0x90] sm:$0xff]  }
   0x9   :  { %544 = vmatpush3.bf16.msra.mxu1 %v589_v7  ;;  %v606_v24 = vld [vmem:[%s779_s1 + $0x48] sm:$0xff]   ;;  %v610_v28 = vld [vmem:[%s779_s1 + $0x40] sm:$0xff]   ;;  %v620_v37 = vld [vmem:[%s779_s1 + $0x118] sm:$0xff]  }
   0xa   :  { %545 = vmatprep.subr.bf16.mxu1 %v592_v10  ;;  %v607_v25 = vld [vmem:[%s779_s1 + $0x8] sm:$0xff]   ;;  %v611_v29 = vld [vmem:[%s779_s1] sm:$0xff]   ;;  %v621_v38 = vld [vmem:[%s779_s1 + $0x110] sm:$0xff]  }
   0xb   :  { %524 = vmatpush3.bf16.msra.mxu0 %v591_v9  ;;  %v608_v26 = vld [vmem:[%s779_s1 + $0xc8] sm:$0xff]   ;;  %v612_v30 = vld [vmem:[%s779_s1 + $0xc0] sm:$0xff]  }
   0xc   :  { %525 = vmatprep.subr.bf16.mxu0 %v594_v12  ;;  %v609_v27 = vld [vmem:[%s779_s1 + $0x88] sm:$0xff]   ;;  %v613_v31 = vld [vmem:[%s780_s0] ss:$20 sps:$4 sm:$0xff]   ;;  %v615_v32 = vld [vmem:[%s780_s0 + $0x4] ss:$20 sps:$4 sm:$0xff]  }
   0xd   :  { %546 = vmatpush3.bf16.msra.mxu1 %v593_v11  ;;  %v616_v34 = vld [vmem:[%s779_s1 + $0x80] sm:$0xff]   ;;  %377 = vmatprep.mubr.bf16.mxu0 %v615_v32  ;;  %v617_v35 = vld [vmem:[%s780_s0 + $0x8] ss:$20 sps:$4 sm:$0xff]  }
   0xe   :  { %547 = vmatprep.subr.bf16.mxu1 %v596_v14  ;;  %v619_v36 = vld [vmem:[%s780_s0 + $0xc] ss:$20 sps:$4 sm:$0xff]   ;;  %v624_v41 = vld [vmem:[%s780_s0 + $0x10] ss:$20 sps:$4 sm:$0xff]  }
   0xf   :  { %526 = vmatpush3.bf16.msra.mxu0 %v595_v13  ;;  %418 = vmatprep.mubr.bf16.mxu1 %v619_v36  ;;  %v622_v39 = vld [vmem:[%s779_s1 + $0x108] sm:$0xff]   ;;  %v623_v40 = vld [vmem:[%s779_s1 + $0x100] sm:$0xff]  }
  0x10   :  { %527 = vmatprep.subr.bf16.mxu0 %v598_v16  ;;  %v476_v48 = vld [vmem:[%s781_s2] ss:$0 sm:$0xff] }
  0x11   :  { %548 = vmatpush3.bf16.msra.mxu1 %v597_v15 }
  0x12   :  { %549 = vmatprep.subr.bf16.mxu1 %v600_v18 }
  0x13   :  { %528 = vmatpush3.bf16.msra.mxu0 %v599_v17 }
  0x14   :  { %529 = vmatprep.subr.bf16.mxu0 %v602_v20 }
  0x15   :  { %550 = vmatpush3.bf16.msra.mxu1 %v601_v19 }
  0x16   :  { %551 = vmatprep.subr.bf16.mxu1 %v604_v22 }
  0x17   :  { %530 = vmatpush3.bf16.msra.mxu0 %v603_v21 }
  0x18   :  { %531 = vmatprep.subr.bf16.mxu0 %v606_v24 }
  0x19   :  { %552 = vmatpush3.bf16.msra.mxu1 %v605_v23 }
  0x1a   :  { %553 = vmatprep.subr.bf16.mxu1 %v608_v26 }
  0x1b   :  { %532 = vmatpush3.bf16.msra.mxu0 %v607_v25 }
  0x1c   :  { %533 = vmatprep.subr.bf16.mxu0 %v610_v28 }
  0x1d   :  { %554 = vmatpush3.bf16.msra.mxu1 %v609_v27 }
  0x1e   :  { %555 = vmatprep.subr.bf16.mxu1 %v612_v30 }
  0x1f   :  { %534 = vmatpush3.bf16.msra.mxu0 %v611_v29 }
  0x20   :  { %568 = vmatprep.subr.bf16.mxu0 %v625_v33 }
  0x21   :  { %556 = vmatpush3.bf16.msra.mxu1 %v616_v34 }
  0x22   :  { %378 = vmatmul.mubr.bf16.vlgmr.msra.gmra.mxu0 %v613_v31 }
  0x23   :  { %576 = vmatprep.mubr.msk.bf16.mxu0 %vm626_vm0, %v625_v33  ;;  %569 = vmatpush3.bf16.msra.mxu0 %v620_v37 }
  0x24   :  { %419 = vmatmul.mubr.bf16.vlgmr.msra.gmra.mxu1 %v617_v35  ;;  %570 = vmatprep.subr.bf16.mxu0 %v625_v33 }
  0x27   :  { %571 = vmatpush3.bf16.msra.mxu0 %v621_v38 }
  0x28   :  { %572 = vmatprep.subr.bf16.mxu0 %v625_v33 }
  0x2b   :  { %573 = vmatpush3.bf16.msra.mxu0 %v622_v39 }
  0x2c   :  { %574 = vmatprep.subr.bf16.mxu0 %v625_v33 }
  0x2f   :  { %575 = vmatpush3.bf16.msra.mxu0 %v623_v40 }
  0x32   :  { %577 = vmatmul.mubr.msk.bf16.vlgmr.msra.gmra.mxu0 %vm341_vm1, %v624_v41 }
  0xe2   :  { %v535_v42 = vpop.f32.mrf.mxu0 }
  0xe4   :  { %v536_v43 = vpop.f32.mrf.mxu0  ;;  %v557_v44 = vpop.f32.mrf.mxu1 }
  0xe5   :  { %v537_v47 = vadd.f32 %v536_v43, %v535_v42 }
  0xe6   :  { %v538_v45 = vpop.f32.mrf.mxu0  ;;  %v558_v46 = vpop.f32.mrf.mxu1 }
  0xe7   :  { %v380_v51 = vadd.f32 %v537_v47, %v476_v48  ;;  %v559_v52 = vadd.f32 %v558_v46, %v557_v44 }
  0xe8   :  { %v539_v49 = vpop.f32.mrf.mxu0  ;;  %v560_v50 = vpop.f32.mrf.mxu1 }
  0xe9   :  { %v540_v53 = vadd.f32 %v539_v49, %v538_v45  ;;  %v421_v57 = vadd.f32 %v559_v52, %v380_v51 }
  0xea   :  { %v561_v54 = vpop.f32.mrf.mxu1 }
  0xeb   :  { %v383_v55 = vadd.f32 %v540_v53, %v476_v48  ;;  %v562_v56 = vadd.f32 %v561_v54, %v560_v50 }
  0xed   :  { %v424_v62 = vadd.f32 %v562_v56, %v383_v55 }
  0xf2   :  { %v461_v58 = vpop.f32.mrf.mxu0 }
  0xf3   :  { %v462_v59 = vadd.f32 %v461_v58, %v421_v57 }
  0xf4   :  { %v578_v60 = vpop.f32.mrf.mxu0 }
  0xf5   :  { %v468_v61 = vmax.f32 %v462_v59, 0.0 }
  0xf6   :  { %v464_v63 = vpop.f32.mrf.mxu0 }
  0xf7   :  { %470 = vst [vmem:[%s782_s3] sm:$0xff] %v468_v61  ;;  %v465_v0 = vadd.f32 %v464_v63, %v424_v62 }
  0xf8   :  { %v579_v1 = vpop.f32.mrf.mxu0 }
  0xf9   :  { %v469_v2 = vmax.f32 %v465_v0, 0.0 }
  0xfb   :  { %471 = vst [vmem:[%s782_s3 + $0x8] sm:$0xff] %v469_v2 }

</bundles_post_ra>
